<compile_context>
chip_gen: v7x
topology: tpu7x:2x2x1
jax: 0.10.0
libtpu: 0.0.40
codegen_flags: <defaults>
</compile_context>

<pallas_src>
import functools

import numpy as np
import jax
import jax.numpy as jnp
from jax import lax
from jax.experimental import pallas as pl
from jax.experimental.pallas import tpu as pltpu

LN_EPS = 1e-5  # PyTorch nn.LayerNorm default


def _silu(x):
    return x * jax.nn.sigmoid(x)


def _layernorm(x, gamma, beta):
    mean = jnp.mean(x, axis=-1, keepdims=True)
    var = jnp.mean(jnp.square(x - mean), axis=-1, keepdims=True)
    return (x - mean) * lax.rsqrt(var + LN_EPS) * gamma + beta


def _round_up(x, m):
    return (x + m - 1) // m * m


def _default_vmem_limit():
    # Generation-aware scoped-VMEM limit: ~96 MiB on v5e/v6e (128 MiB physical),
    # ~48 MiB on v7x (64 MiB/TC).  Fallback if get_tpu_info is unavailable.
    try:
        cap = int(pltpu.get_tpu_info().vmem_capacity_bytes)
    except Exception:
        cap = 64 * 1024 * 1024
    return max(32 * 1024 * 1024, min(3 * cap // 4, 96 * 1024 * 1024))


def _pick_tiles(n_edges, n_dst):
    # tile_e: lane dim of the dst-index block -> multiple of 128 (or full padded dim).
    # tile_n: sublane dim of grid/out blocks -> multiple of 8.
    # Defaults keep the in-kernel one-hot intermediates (~8-16 B/elem * tile_n*tile_e)
    # around 8-16 MiB so they fit v7x's smaller VMEM alongside double-buffered inputs.
    tile_e = min(2048, _round_up(max(n_edges, 1), 128))
    tile_n = min(512, _round_up(max(n_dst, 1), 8))
    return tile_e, tile_n


# ------------------------------ fused kernel -------------------------------- #

def _fused_decoder_kernel(eblk_ref, espan_ref,                  # scalar prefetch (SMEM)
                          dst_ref, xin_ref, grid_ref,           # data tiles
                          w1e_ref, b1e_ref, w2e_ref, b2e_ref, lge_ref, lbe_ref,
                          w1a_ref, w1b_ref, b1n_ref, w2n_ref, b2n_ref,
                          lgn_ref, lbn_ref,
                          out_ref, acc_ref):
    n = pl.program_id(0)
    e = pl.program_id(1)

    @pl.when(e == 0)
    def _():
        acc_ref[...] = jnp.zeros_like(acc_ref)

    # Only edge blocks that actually overlap this node tile's sorted-edge range carry
    # work; steps beyond the per-tile span are skipped (DMA index is clamped in the
    # index_map, compute is gated here).
    @pl.when(e < espan_ref[n])
    def _():
        # --- edge MLP on this edge tile (fused 3-way first layer, K = 8+16+16) -----
        h = jnp.dot(xin_ref[...], w1e_ref[...],
                    preferred_element_type=jnp.float32) + b1e_ref[...]
        h = _silu(h)
        eo = jnp.dot(h.astype(jnp.bfloat16), w2e_ref[...],
                     preferred_element_type=jnp.float32) + b2e_ref[...]
        eo = _layernorm(eo, lge_ref[...], lbe_ref[...])          # f32 (tile_e, d_eo)

        # --- "sum" aggregation: one-hot block built in-kernel (f32, offset hoisted
        #     onto the [1, tile_e] operand) and reduced on the MXU into f32 acc. -----
        tile_n = acc_ref.shape[0]
        tile_e = dst_ref.shape[1]
        local_dst = dst_ref[...] - n * tile_n                    # (1, tile_e) int32
        row_ids = lax.broadcasted_iota(jnp.int32, (tile_n, tile_e), 0)
        onehot = jnp.where(row_ids == local_dst, 1.0, 0.0).astype(jnp.float32)
        acc_ref[...] += jnp.dot(onehot, eo, preferred_element_type=jnp.float32)

    @pl.when(e == pl.num_programs(1) - 1)
    def _():
        g = grid_ref[...]
        # concat(agg, grid) @ W1 == agg @ W1a + grid @ W1b  (W1 pre-split in wrapper).
        # Kept fully f32: the aggregated sum is never downcast to bf16.
        h = (jnp.dot(acc_ref[...], w1a_ref[...], preferred_element_type=jnp.float32)
             + jnp.dot(g, w1b_ref[...], preferred_element_type=jnp.float32)
             + b1n_ref[...])
        h = _silu(h)
        o = jnp.dot(h, w2n_ref[...], preferred_element_type=jnp.float32) + b2n_ref[...]
        o = _layernorm(o, lgn_ref[...], lbn_ref[...])
        out_ref[...] = (o + g).astype(out_ref.dtype)             # residual with grid


# ------------------------------ jitted compute ------------------------------- #

@functools.partial(
    jax.jit,
    static_argnames=("tile_e", "tile_n", "max_span", "e_pad", "n_pad", "vmem_limit"))
def _decoder_compute(params, order, src_sorted, dst2d, eblk_start, espan,
                     efeat, m2m, grid, *, tile_e, tile_n, max_span, e_pad, n_pad,
                     vmem_limit):
    E = efeat.shape[0]
    n_dst, dst_in = grid.shape
    p, q = params["edge_mlp"], params["node_mlp"]
    hidden = p["we"].shape[1]
    d_eo = p["w2"].shape[1]
    node_out = q["w2"].shape[1]

    n_tiles = n_pad // tile_n
    e_blocks = e_pad // tile_e

    # --- glue (XLA): dst-sorted gathers + concat + pad + bf16 cast ----------------
    dst_sorted = dst2d[0, :E]
    xin = jnp.concatenate([efeat[order], m2m[src_sorted], grid[dst_sorted]], axis=-1)
    xin = jnp.pad(xin, ((0, e_pad - E), (0, 0))).astype(jnp.bfloat16)
    d_in = xin.shape[1]

    grid_pad = jnp.pad(grid, ((0, n_pad - n_dst), (0, 0))).astype(jnp.float32)

    w1e = jnp.concatenate([p["we"], p["ws"], p["wd"]], axis=0).astype(jnp.bfloat16)
    w2e = p["w2"].astype(jnp.bfloat16)

    # --- data-dependent index maps driven by the scalar-prefetched block ranges ----
    def xin_map(n, e, eblk, esp):
        return (jnp.minimum(eblk[n] + e, e_blocks - 1), 0)

    def dst_map(n, e, eblk, esp):
        return (0, jnp.minimum(eblk[n] + e, e_blocks - 1))

    def node_map(n, e, eblk, esp):
        return (n, 0)

    def const_map(n, e, eblk, esp):
        return (0, 0)

    edge_visits = n_tiles * max_span * tile_e   # upper bound on edge rows touched
    flops = (2 * edge_visits * (d_in * hidden + hidden * d_eo)       # edge MLP
             + 2 * edge_visits * tile_n * d_eo                       # one-hot scatter
             + 2 * n_pad * ((d_eo + dst_in) * hidden + hidden * node_out))
    bytes_accessed = (2 * edge_visits * d_in + 4 * edge_visits
                      + 4 * n_pad * (dst_in + node_out)
                      + 2 * (w1e.size + w2e.size) + 4096)

    out = pl.pallas_call(
        _fused_decoder_kernel,
        out_shape=jax.ShapeDtypeStruct((n_pad, node_out), jnp.float32),
        grid_spec=pltpu.PrefetchScalarGridSpec(
            num_scalar_prefetch=2,
            grid=(n_tiles, max_span),
            in_specs=[
                pl.BlockSpec((1, tile_e), dst_map),          # sorted dst indices
                pl.BlockSpec((tile_e, d_in), xin_map),       # [e | m2m[src] | grid[dst]]
                pl.BlockSpec((tile_n, dst_in), node_map),    # grid node tile
                pl.BlockSpec((d_in, hidden), const_map),     # edge W1 (We;Ws;Wd stacked)
                pl.BlockSpec((1, hidden), const_map),        # edge b1
                pl.BlockSpec((hidden, d_eo), const_map),     # edge W2
                pl.BlockSpec((1, d_eo), const_map),          # edge b2
                pl.BlockSpec((1, d_eo), const_map),          # edge LN gamma
                pl.BlockSpec((1, d_eo), const_map),          # edge LN beta
                pl.BlockSpec((d_eo, hidden), const_map),     # node W1a (agg rows)
                pl.BlockSpec((dst_in, hidden), const_map),   # node W1b (grid rows)
                pl.BlockSpec((1, hidden), const_map),        # node b1
                pl.BlockSpec((hidden, node_out), const_map), # node W2
                pl.BlockSpec((1, node_out), const_map),      # node b2
                pl.BlockSpec((1, node_out), const_map),      # node LN gamma
                pl.BlockSpec((1, node_out), const_map),      # node LN beta
            ],
            out_specs=pl.BlockSpec((tile_n, node_out), node_map),
            scratch_shapes=[pltpu.VMEM((tile_n, d_eo), jnp.float32)]),
        compiler_params=pltpu.CompilerParams(
            dimension_semantics=("parallel", "arbitrary"),
            vmem_limit_bytes=vmem_limit),
        cost_estimate=pl.CostEstimate(
            flops=int(flops),
            transcendentals=int(edge_visits * hidden + n_pad * hidden),
            bytes_accessed=int(bytes_accessed)),
    )(eblk_start, espan, dst2d, xin, grid_pad,
      w1e, p["b1"], w2e, p["b2"], p["ln_g"], p["ln_b"],
      q["w1a"].astype(jnp.float32), q["w1b"].astype(jnp.float32), q["b1"],
      q["w2"].astype(jnp.float32), q["b2"], q["ln_g"], q["ln_b"])

    return out[:n_dst]


# --------------------------------- wrapper ----------------------------------- #

def mesh_graph_decoder_forward(params, src_idx, dst_idx,
                               m2g_edge_embedded, m2m_node_processed,
                               grid_input_encoded, *, tile_e=None, tile_n=None):
    """Graph structure (src/dst indices) is treated as host-side static data (as it is
    for a DGLGraph): edges are sorted by dst and per-node-tile edge-block ranges are
    precomputed with numpy; only the feature tensors are traced / jitted."""
    src_np = np.asarray(jax.device_get(src_idx)).astype(np.int64)
    dst_np = np.asarray(jax.device_get(dst_idx)).astype(np.int64)
    E = int(dst_np.shape[0])
    n_dst = int(grid_input_encoded.shape[0])

    te_d, tn_d = _pick_tiles(E, n_dst)
    tile_e = int(tile_e or te_d)
    tile_n = int(tile_n or tn_d)

    e_pad = _round_up(max(E, 1), tile_e)
    n_pad = _round_up(max(n_dst, 1), tile_n)
    n_tiles = n_pad // tile_n

    # Sort edges by destination -> each node tile owns a contiguous sorted-edge range.
    order = np.argsort(dst_np, kind="stable").astype(np.int32)
    dst_sorted = dst_np[order]
    src_sorted = src_np[order].astype(np.int32)

    bounds = np.arange(n_tiles + 1, dtype=np.int64) * tile_n
    starts = np.searchsorted(dst_sorted, bounds[:-1], side="left")
    ends = np.searchsorted(dst_sorted, bounds[1:], side="left")
    eblk_start = (starts // tile_e).astype(np.int32)
    eblk_end = np.where(ends > starts, (ends - 1) // tile_e + 1, starts // tile_e)
    espan = (eblk_end - eblk_start).astype(np.int32)
    max_span = max(int(espan.max()) if espan.size else 1, 1)

    dst_pad = np.full((1, e_pad), -1, np.int32)   # -1 never matches a node id
    dst_pad[0, :E] = dst_sorted

    return _decoder_compute(
        params, jnp.asarray(order), jnp.asarray(src_sorted), jnp.asarray(dst_pad),
        jnp.asarray(eblk_start), jnp.asarray(espan),
        m2g_edge_embedded, m2m_node_processed, grid_input_encoded,
        tile_e=tile_e, tile_n=tile_n, max_span=max_span,
        e_pad=e_pad, n_pad=n_pad, vmem_limit=_default_vmem_limit())


# --------------------------- reference (pure JAX) ---------------------------- #

def reference_forward(params, src_idx, dst_idx, efeat, m2m, grid):
    hp = lax.Precision.HIGHEST
    p = params["edge_mlp"]
    h = (jnp.dot(efeat, p["we"], precision=hp)
         + jnp.dot(m2m[src_idx], p["ws"], precision=hp)
         + jnp.dot(grid[dst_idx], p["wd"], precision=hp) + p["b1"])
    h = _silu(h)
    eo = jnp.dot(h, p["w2"], precision=hp) + p["b2"]
    eo = _layernorm(eo, p["ln_g"], p["ln_b"])

    n_dst = grid.shape[0]
    agg = jax.ops.segment_sum(eo, dst_idx, num_segments=n_dst)

    q = params["node_mlp"]
    cat = jnp.concatenate([agg, grid], axis=-1)
    w1 = jnp.concatenate([q["w1a"], q["w1b"]], axis=0)
    h2 = _silu(jnp.dot(cat, w1, precision=hp) + q["b1"])
    o = jnp.dot(h2, q["w2"], precision=hp) + q["b2"]
    o = _layernorm(o, q["ln_g"], q["ln_b"])
    return o + grid


# ------------------------------ init + main ---------------------------------- #

def init_params(key, edges_in, src_in, dst_in, edges_out, node_out, hidden):
    ks = jax.random.split(key, 8)
    s = 0.1

    def w(k, shape):
        return (s * jax.random.normal(k, shape)).astype(jnp.float32)

    edge_mlp = dict(
        we=w(ks[0], (edges_in, hidden)),
        ws=w(ks[1], (src_in, hidden)),
        wd=w(ks[2], (dst_in, hidden)),
        b1=jnp.zeros((1, hidden), jnp.float32),
        w2=w(ks[3], (hidden, edges_out)),
        b2=jnp.zeros((1, edges_out), jnp.float32),
        ln_g=jnp.ones((1, edges_out), jnp.float32),
        ln_b=jnp.zeros((1, edges_out), jnp.float32),
    )
    node_mlp = dict(
        w1a=w(ks[4], (edges_out, hidden)),   # W1 rows hitting aggregated edge feats
        w1b=w(ks[5], (dst_in, hidden)),      # W1 rows hitting grid node feats
        b1=jnp.zeros((1, hidden), jnp.float32),
        w2=w(ks[6], (hidden, node_out)),
        b2=jnp.zeros((1, node_out), jnp.float32),
        ln_g=jnp.ones((1, node_out), jnp.float32),
        ln_b=jnp.zeros((1, node_out), jnp.float32),
    )
    return dict(edge_mlp=edge_mlp, node_mlp=node_mlp)


if __name__ == "__main__":
    # small shapes
    E, N_SRC, N_DST = 64, 24, 32
    EDGES_IN, SRC_IN, DST_IN = 8, 16, 16
    EDGES_OUT, NODE_OUT, HIDDEN = 16, 16, 32   # NODE_OUT == DST_IN (residual add)

    key = jax.random.PRNGKey(0)
    k_e, k_m, k_g, k_src, k_dst, k_p = jax.random.split(key, 6)

    m2g_edge_embedded = jax.random.normal(k_e, (E, EDGES_IN), jnp.float32)
    m2m_node_processed = jax.random.normal(k_m, (N_SRC, SRC_IN), jnp.float32)
    grid_input_encoded = jax.random.normal(k_g, (N_DST, DST_IN), jnp.float32)
    src_idx = jax.random.randint(k_src, (E,), 0, N_SRC)
    dst_idx = jax.random.randint(k_dst, (E,), 0, N_DST)

    params = init_params(k_p, EDGES_IN, SRC_IN, DST_IN, EDGES_OUT, NODE_OUT, HIDDEN)

    out = mesh_graph_decoder_forward(params, src_idx, dst_idx,
                                     m2g_edge_embedded, m2m_node_processed,
                                     grid_input_encoded)
    out = jax.block_until_ready(out)

    ref = reference_forward(params, src_idx, dst_idx,
                            m2g_edge_embedded, m2m_node_processed,
                            grid_input_encoded)
    ref = jax.block_until_ready(ref)

    assert out.shape == (N_DST, NODE_OUT), out.shape
    assert bool(jnp.all(jnp.isfinite(out)))
    assert bool(jnp.allclose(out, ref, rtol=2e-2, atol=2e-2)), \
        float(jnp.max(jnp.abs(out - ref)))

    print("KERNEL_OK")
</pallas_src>

<mosaic_0001>
module attributes {stable_mosaic.version = 11 : i64} {
  func.func @_fused_decoder_kernel(%arg0: i32, %arg1: i32, %arg2: memref<1xi32, #tpu.memory_space<smem>>, %arg3: memref<1xi32, #tpu.memory_space<smem>>, %arg4: memref<1x128xi32, #tpu.memory_space<vmem>>, %arg5: memref<128x40xbf16, #tpu.memory_space<vmem>>, %arg6: memref<32x16xf32, #tpu.memory_space<vmem>>, %arg7: memref<40x32xbf16, #tpu.memory_space<vmem>>, %arg8: memref<1x32xf32, #tpu.memory_space<vmem>>, %arg9: memref<32x16xbf16, #tpu.memory_space<vmem>>, %arg10: memref<1x16xf32, #tpu.memory_space<vmem>>, %arg11: memref<1x16xf32, #tpu.memory_space<vmem>>, %arg12: memref<1x16xf32, #tpu.memory_space<vmem>>, %arg13: memref<16x32xf32, #tpu.memory_space<vmem>>, %arg14: memref<16x32xf32, #tpu.memory_space<vmem>>, %arg15: memref<1x32xf32, #tpu.memory_space<vmem>>, %arg16: memref<32x16xf32, #tpu.memory_space<vmem>>, %arg17: memref<1x16xf32, #tpu.memory_space<vmem>>, %arg18: memref<1x16xf32, #tpu.memory_space<vmem>>, %arg19: memref<1x16xf32, #tpu.memory_space<vmem>>, %arg20: memref<32x16xf32, #tpu.memory_space<vmem>>, %arg21: memref<32x16xf32, #tpu.memory_space<vmem>>) attributes {dimension_semantics = [#tpu.dimension_semantics<parallel>, #tpu.dimension_semantics<arbitrary>], iteration_bounds = array<i64: 1, 1>, scalar_prefetch = 2 : i64, scratch_operands = 1 : i64, tpu.core_type = #tpu.core_type<tc>, window_params = [{transform_indices = @transform_0, window_bounds = array<i64: 1, 128>}, {transform_indices = @transform_1, window_bounds = array<i64: 128, 40>}, {transform_indices = @transform_2, window_bounds = array<i64: 32, 16>}, {pipeline_mode = #tpu.pipeline_mode<synchronous>, transform_indices = @transform_3, window_bounds = array<i64: 40, 32>}, {pipeline_mode = #tpu.pipeline_mode<synchronous>, transform_indices = @transform_4, window_bounds = array<i64: 1, 32>}, {pipeline_mode = #tpu.pipeline_mode<synchronous>, transform_indices = @transform_5, window_bounds = array<i64: 32, 16>}, {pipeline_mode = #tpu.pipeline_mode<synchronous>, transform_indices = @transform_6, window_bounds = array<i64: 1, 16>}, {pipeline_mode = #tpu.pipeline_mode<synchronous>, transform_indices = @transform_7, window_bounds = array<i64: 1, 16>}, {pipeline_mode = #tpu.pipeline_mode<synchronous>, transform_indices = @transform_8, window_bounds = array<i64: 1, 16>}, {pipeline_mode = #tpu.pipeline_mode<synchronous>, transform_indices = @transform_9, window_bounds = array<i64: 16, 32>}, {pipeline_mode = #tpu.pipeline_mode<synchronous>, transform_indices = @transform_10, window_bounds = array<i64: 16, 32>}, {pipeline_mode = #tpu.pipeline_mode<synchronous>, transform_indices = @transform_11, window_bounds = array<i64: 1, 32>}, {pipeline_mode = #tpu.pipeline_mode<synchronous>, transform_indices = @transform_12, window_bounds = array<i64: 32, 16>}, {pipeline_mode = #tpu.pipeline_mode<synchronous>, transform_indices = @transform_13, window_bounds = array<i64: 1, 16>}, {pipeline_mode = #tpu.pipeline_mode<synchronous>, transform_indices = @transform_14, window_bounds = array<i64: 1, 16>}, {pipeline_mode = #tpu.pipeline_mode<synchronous>, transform_indices = @transform_15, window_bounds = array<i64: 1, 16>}, {transform_indices = @transform_16, window_bounds = array<i64: 32, 16>}]} {
    %c0_i32 = arith.constant 0 : i32
    %0 = arith.cmpi eq, %arg1, %c0_i32 : i32
    %1 = arith.extui %0 : i1 to i32
    %c0_i32_0 = arith.constant 0 : i32
    %2 = arith.cmpi ne, %1, %c0_i32_0 : i32
    scf.if %2 {
      %cst = arith.constant 0.000000e+00 : f32
      %11 = vector.broadcast %cst : f32 to vector<32x16xf32>
      %c0 = arith.constant 0 : index
      %c0_4 = arith.constant 0 : index
      %12 = vector.load %arg21[%c0, %c0_4] : memref<32x16xf32, #tpu.memory_space<vmem>>, vector<32x16xf32>
      tpu.vector_store %arg21[%c0, %c0_4], %11 {strides = array<i32>} : memref<32x16xf32, #tpu.memory_space<vmem>>, vector<32x16xf32>,
    } else {
    }
    %3 = arith.index_cast %arg0 : i32 to index
    %4 = memref.load %arg3[%3] : memref<1xi32, #tpu.memory_space<smem>>
    %5 = arith.cmpi slt, %arg1, %4 : i32
    %6 = arith.extui %5 : i1 to i32
    %c0_i32_1 = arith.constant 0 : i32
    %7 = arith.cmpi ne, %6, %c0_i32_1 : i32
    scf.if %7 {
      %c0 = arith.constant 0 : index
      %c0_4 = arith.constant 0 : index
      %11 = vector.load %arg5[%c0, %c0_4] : memref<128x40xbf16, #tpu.memory_space<vmem>>, vector<128x40xbf16>
      %c0_5 = arith.constant 0 : index
      %c0_6 = arith.constant 0 : index
      %12 = vector.load %arg7[%c0_5, %c0_6] : memref<40x32xbf16, #tpu.memory_space<vmem>>, vector<40x32xbf16>
      %cst = arith.constant dense<0.000000e+00> : vector<128x32xf32>
      %13 = tpu.matmul %11, %12, %cst {dimension_numbers = #tpu.dot_dimension_numbers<[1], [0], [0], [1], [0, 0, 1, 1], [], []>} : vector<128x40xbf16>, vector<40x32xbf16>, vector<128x32xf32> -> vector<128x32xf32>
      %c0_7 = arith.constant 0 : index
      %c0_8 = arith.constant 0 : index
      %14 = vector.load %arg8[%c0_7, %c0_8] : memref<1x32xf32, #tpu.memory_space<vmem>>, vector<1x32xf32>
      %15 = vector.broadcast %14 : vector<1x32xf32> to vector<128x32xf32>
      %16 = arith.addf %13, %15 : vector<128x32xf32>
      %17 = arith.negf %16 : vector<128x32xf32>
      %18 = math.exp %17 : vector<128x32xf32>
      %cst_9 = arith.constant 1.000000e+00 : f32
      %19 = vector.broadcast %cst_9 : f32 to vector<128x32xf32>
      %20 = arith.addf %19, %18 : vector<128x32xf32>
      %21 = arith.divf %19, %20 : vector<128x32xf32>
      %22 = arith.mulf %16, %21 : vector<128x32xf32>
      %23 = arith.truncf %22 : vector<128x32xf32> to vector<128x32xbf16>
      %c0_10 = arith.constant 0 : index
      %c0_11 = arith.constant 0 : index
      %24 = vector.load %arg9[%c0_10, %c0_11] : memref<32x16xbf16, #tpu.memory_space<vmem>>, vector<32x16xbf16>
      %cst_12 = arith.constant dense<0.000000e+00> : vector<128x16xf32>
      %25 = tpu.matmul %23, %24, %cst_12 {dimension_numbers = #tpu.dot_dimension_numbers<[1], [0], [0], [1], [0, 0, 1, 1], [], []>} : vector<128x32xbf16>, vector<32x16xbf16>, vector<128x16xf32> -> vector<128x16xf32>
      %c0_13 = arith.constant 0 : index
      %c0_14 = arith.constant 0 : index
      %26 = vector.load %arg10[%c0_13, %c0_14] : memref<1x16xf32, #tpu.memory_space<vmem>>, vector<1x16xf32>
      %27 = vector.broadcast %26 : vector<1x16xf32> to vector<128x16xf32>
      %28 = arith.addf %25, %27 : vector<128x16xf32>
      %c0_15 = arith.constant 0 : index
      %c0_16 = arith.constant 0 : index
      %29 = vector.load %arg11[%c0_15, %c0_16] : memref<1x16xf32, #tpu.memory_space<vmem>>, vector<1x16xf32>
      %c0_17 = arith.constant 0 : index
      %c0_18 = arith.constant 0 : index
      %30 = vector.load %arg12[%c0_17, %c0_18] : memref<1x16xf32, #tpu.memory_space<vmem>>, vector<1x16xf32>
      %cst_19 = arith.constant dense<0.000000e+00> : vector<128xf32>
      %31 = vector.multi_reduction <add>, %28, %cst_19 [1] : vector<128x16xf32> to vector<128xf32>
      %32 = vector.shape_cast %31 : vector<128xf32> to vector<128x1xf32>
      %cst_20 = arith.constant 1.600000e+01 : f32
      %33 = vector.broadcast %cst_20 : f32 to vector<128x1xf32>
      %34 = arith.divf %32, %33 : vector<128x1xf32>
      %35 = vector.broadcast %34 : vector<128x1xf32> to vector<128x16xf32>
      %36 = arith.subf %28, %35 : vector<128x16xf32>
      %37 = arith.mulf %36, %36 : vector<128x16xf32>
      %cst_21 = arith.constant dense<0.000000e+00> : vector<128xf32>
      %38 = vector.multi_reduction <add>, %37, %cst_21 [1] : vector<128x16xf32> to vector<128xf32>
      %39 = vector.shape_cast %38 : vector<128xf32> to vector<128x1xf32>
      %cst_22 = arith.constant 1.600000e+01 : f32
      %40 = vector.broadcast %cst_22 : f32 to vector<128x1xf32>
      %41 = arith.divf %39, %40 : vector<128x1xf32>
      %42 = vector.broadcast %34 : vector<128x1xf32> to vector<128x16xf32>
      %43 = arith.subf %28, %42 : vector<128x16xf32>
      %cst_23 = arith.constant 9.99999974E-6 : f32
      %44 = vector.broadcast %cst_23 : f32 to vector<128x1xf32>
      %45 = arith.addf %41, %44 : vector<128x1xf32>
      %46 = math.rsqrt %45 : vector<128x1xf32>
      %47 = vector.broadcast %46 : vector<128x1xf32> to vector<128x16xf32>
      %48 = arith.mulf %43, %47 : vector<128x16xf32>
      %49 = vector.broadcast %29 : vector<1x16xf32> to vector<128x16xf32>
      %50 = arith.mulf %48, %49 : vector<128x16xf32>
      %51 = vector.broadcast %30 : vector<1x16xf32> to vector<128x16xf32>
      %52 = arith.addf %50, %51 : vector<128x16xf32>
      %c0_24 = arith.constant 0 : index
      %c0_25 = arith.constant 0 : index
      %53 = vector.load %arg4[%c0_24, %c0_25] : memref<1x128xi32, #tpu.memory_space<vmem>>, vector<1x128xi32>
      %c32_i32 = arith.constant 32 : i32
      %54 = arith.muli %arg0, %c32_i32 : i32
      %55 = vector.broadcast %54 : i32 to vector<1x128xi32>
      %56 = arith.subi %53, %55 : vector<1x128xi32>
      %57 = tpu.iota {dimensions = array<i32: 0>} : vector<32x128xi32>
      %58 = vector.broadcast %56 : vector<1x128xi32> to vector<32x128xi32>
      %59 = arith.cmpi eq, %57, %58 : vector<32x128xi32>
      %cst_26 = arith.constant 1.000000e+00 : f32
      %cst_27 = arith.constant 0.000000e+00 : f32
      %60 = vector.broadcast %cst_26 : f32 to vector<32x128xf32>
      %61 = vector.broadcast %cst_27 : f32 to vector<32x128xf32>
      %62 = arith.select %59, %60, %61 : vector<32x128xi1>, vector<32x128xf32>
      %c0_28 = arith.constant 0 : index
      %c0_29 = arith.constant 0 : index
      %63 = vector.load %arg21[%c0_28, %c0_29] : memref<32x16xf32, #tpu.memory_space<vmem>>, vector<32x16xf32>
      %cst_30 = arith.constant dense<0.000000e+00> : vector<32x16xf32>
      %64 = tpu.matmul %62, %52, %cst_30 {dimension_numbers = #tpu.dot_dimension_numbers<[1], [0], [0], [1], [0, 0, 1, 1], [], []>} : vector<32x128xf32>, vector<128x16xf32>, vector<32x16xf32> -> vector<32x16xf32>
      %65 = arith.addf %63, %64 : vector<32x16xf32>
      %c0_31 = arith.constant 0 : index
      %c0_32 = arith.constant 0 : index
      %66 = vector.load %arg21[%c0_31, %c0_32] : memref<32x16xf32, #tpu.memory_space<vmem>>, vector<32x16xf32>
      tpu.vector_store %arg21[%c0_31, %c0_32], %65 {strides = array<i32>} : memref<32x16xf32, #tpu.memory_space<vmem>>, vector<32x16xf32>,
    } else {
    }
    %c0_i32_2 = arith.constant 0 : i32
    %8 = arith.cmpi eq, %arg1, %c0_i32_2 : i32
    %9 = arith.extui %8 : i1 to i32
    %c0_i32_3 = arith.constant 0 : i32
    %10 = arith.cmpi ne, %9, %c0_i32_3 : i32
    scf.if %10 {
      %c0 = arith.constant 0 : index
      %c0_4 = arith.constant 0 : index
      %11 = vector.load %arg6[%c0, %c0_4] : memref<32x16xf32, #tpu.memory_space<vmem>>, vector<32x16xf32>
      %c0_5 = arith.constant 0 : index
      %c0_6 = arith.constant 0 : index
      %12 = vector.load %arg21[%c0_5, %c0_6] : memref<32x16xf32, #tpu.memory_space<vmem>>, vector<32x16xf32>
      %c0_7 = arith.constant 0 : index
      %c0_8 = arith.constant 0 : index
      %13 = vector.load %arg13[%c0_7, %c0_8] : memref<16x32xf32, #tpu.memory_space<vmem>>, vector<16x32xf32>
      %cst = arith.constant dense<0.000000e+00> : vector<32x32xf32>
      %14 = tpu.matmul %12, %13, %cst {dimension_numbers = #tpu.dot_dimension_numbers<[1], [0], [0], [1], [0, 0, 1, 1], [], []>} : vector<32x16xf32>, vector<16x32xf32>, vector<32x32xf32> -> vector<32x32xf32>
      %c0_9 = arith.constant 0 : index
      %c0_10 = arith.constant 0 : index
      %15 = vector.load %arg14[%c0_9, %c0_10] : memref<16x32xf32, #tpu.memory_space<vmem>>, vector<16x32xf32>
      %cst_11 = arith.constant dense<0.000000e+00> : vector<32x32xf32>
      %16 = tpu.matmul %11, %15, %cst_11 {dimension_numbers = #tpu.dot_dimension_numbers<[1], [0], [0], [1], [0, 0, 1, 1], [], []>} : vector<32x16xf32>, vector<16x32xf32>, vector<32x32xf32> -> vector<32x32xf32>
      %17 = arith.addf %14, %16 : vector<32x32xf32>
      %c0_12 = arith.constant 0 : index
      %c0_13 = arith.constant 0 : index
      %18 = vector.load %arg15[%c0_12, %c0_13] : memref<1x32xf32, #tpu.memory_space<vmem>>, vector<1x32xf32>
      %19 = vector.broadcast %18 : vector<1x32xf32> to vector<32x32xf32>
      %20 = arith.addf %17, %19 : vector<32x32xf32>
      %21 = arith.negf %20 : vector<32x32xf32>
      %22 = math.exp %21 : vector<32x32xf32>
      %cst_14 = arith.constant 1.000000e+00 : f32
      %23 = vector.broadcast %cst_14 : f32 to vector<32x32xf32>
      %24 = arith.addf %23, %22 : vector<32x32xf32>
      %25 = arith.divf %23, %24 : vector<32x32xf32>
      %26 = arith.mulf %20, %25 : vector<32x32xf32>
      %c0_15 = arith.constant 0 : index
      %c0_16 = arith.constant 0 : index
      %27 = vector.load %arg16[%c0_15, %c0_16] : memref<32x16xf32, #tpu.memory_space<vmem>>, vector<32x16xf32>
      %cst_17 = arith.constant dense<0.000000e+00> : vector<32x16xf32>
      %28 = tpu.matmul %26, %27, %cst_17 {dimension_numbers = #tpu.dot_dimension_numbers<[1], [0], [0], [1], [0, 0, 1, 1], [], []>} : vector<32x32xf32>, vector<32x16xf32>, vector<32x16xf32> -> vector<32x16xf32>
      %c0_18 = arith.constant 0 : index
      %c0_19 = arith.constant 0 : index
      %29 = vector.load %arg17[%c0_18, %c0_19] : memref<1x16xf32, #tpu.memory_space<vmem>>, vector<1x16xf32>
      %30 = vector.broadcast %29 : vector<1x16xf32> to vector<32x16xf32>
      %31 = arith.addf %28, %30 : vector<32x16xf32>
      %c0_20 = arith.constant 0 : index
      %c0_21 = arith.constant 0 : index
      %32 = vector.load %arg18[%c0_20, %c0_21] : memref<1x16xf32, #tpu.memory_space<vmem>>, vector<1x16xf32>
      %c0_22 = arith.constant 0 : index
      %c0_23 = arith.constant 0 : index
      %33 = vector.load %arg19[%c0_22, %c0_23] : memref<1x16xf32, #tpu.memory_space<vmem>>, vector<1x16xf32>
      %cst_24 = arith.constant dense<0.000000e+00> : vector<32xf32>
      %34 = vector.multi_reduction <add>, %31, %cst_24 [1] : vector<32x16xf32> to vector<32xf32>
      %35 = vector.shape_cast %34 : vector<32xf32> to vector<32x1xf32>
      %cst_25 = arith.constant 1.600000e+01 : f32
      %36 = vector.broadcast %cst_25 : f32 to vector<32x1xf32>
      %37 = arith.divf %35, %36 : vector<32x1xf32>
      %38 = vector.broadcast %37 : vector<32x1xf32> to vector<32x16xf32>
      %39 = arith.subf %31, %38 : vector<32x16xf32>
      %40 = arith.mulf %39, %39 : vector<32x16xf32>
      %cst_26 = arith.constant dense<0.000000e+00> : vector<32xf32>
      %41 = vector.multi_reduction <add>, %40, %cst_26 [1] : vector<32x16xf32> to vector<32xf32>
      %42 = vector.shape_cast %41 : vector<32xf32> to vector<32x1xf32>
      %cst_27 = arith.constant 1.600000e+01 : f32
      %43 = vector.broadcast %cst_27 : f32 to vector<32x1xf32>
      %44 = arith.divf %42, %43 : vector<32x1xf32>
      %45 = vector.broadcast %37 : vector<32x1xf32> to vector<32x16xf32>
      %46 = arith.subf %31, %45 : vector<32x16xf32>
      %cst_28 = arith.constant 9.99999974E-6 : f32
      %47 = vector.broadcast %cst_28 : f32 to vector<32x1xf32>
      %48 = arith.addf %44, %47 : vector<32x1xf32>
      %49 = math.rsqrt %48 : vector<32x1xf32>
      %50 = vector.broadcast %49 : vector<32x1xf32> to vector<32x16xf32>
      %51 = arith.mulf %46, %50 : vector<32x16xf32>
      %52 = vector.broadcast %32 : vector<1x16xf32> to vector<32x16xf32>
      %53 = arith.mulf %51, %52 : vector<32x16xf32>
      %54 = vector.broadcast %33 : vector<1x16xf32> to vector<32x16xf32>
      %55 = arith.addf %53, %54 : vector<32x16xf32>
      %56 = arith.addf %55, %11 : vector<32x16xf32>
      %c0_29 = arith.constant 0 : index
      %c0_30 = arith.constant 0 : index
      %57 = vector.load %arg20[%c0_29, %c0_30] : memref<32x16xf32, #tpu.memory_space<vmem>>, vector<32x16xf32>
      tpu.vector_store %arg20[%c0_29, %c0_30], %56 {strides = array<i32>} : memref<32x16xf32, #tpu.memory_space<vmem>>, vector<32x16xf32>,
    } else {
    }
    return
  }
  func.func @transform_0(%arg0: i32, %arg1: i32, %arg2: memref<1xi32, #tpu.memory_space<smem>>, %arg3: memref<1xi32, #tpu.memory_space<smem>>) -> (i32, i32) {
    %0 = arith.index_cast %arg0 : i32 to index
    %1 = memref.load %arg2[%0] : memref<1xi32, #tpu.memory_space<smem>>
    %2 = arith.addi %1, %arg1 : i32
    %c0_i32 = arith.constant 0 : i32
    %3 = arith.minsi %2, %c0_i32 : i32
    %c0_i32_0 = arith.constant 0 : i32
    %c0_i32_1 = arith.constant 0 : i32
    return %c0_i32_0, %3 : i32, i32
  }
  func.func @transform_1(%arg0: i32, %arg1: i32, %arg2: memref<1xi32, #tpu.memory_space<smem>>, %arg3: memref<1xi32, #tpu.memory_space<smem>>) -> (i32, i32) {
    %0 = arith.index_cast %arg0 : i32 to index
    %1 = memref.load %arg2[%0] : memref<1xi32, #tpu.memory_space<smem>>
    %2 = arith.addi %1, %arg1 : i32
    %c0_i32 = arith.constant 0 : i32
    %3 = arith.minsi %2, %c0_i32 : i32
    %c0_i32_0 = arith.constant 0 : i32
    %c0_i32_1 = arith.constant 0 : i32
    return %3, %c0_i32_0 : i32, i32
  }
  func.func @transform_2(%arg0: i32, %arg1: i32, %arg2: memref<1xi32, #tpu.memory_space<smem>>, %arg3: memref<1xi32, #tpu.memory_space<smem>>) -> (i32, i32) {
    %c0_i32 = arith.constant 0 : i32
    %c0_i32_0 = arith.constant 0 : i32
    return %arg0, %c0_i32 : i32, i32
  }
  func.func @transform_3(%arg0: i32, %arg1: i32, %arg2: memref<1xi32, #tpu.memory_space<smem>>, %arg3: memref<1xi32, #tpu.memory_space<smem>>) -> (i32, i32) {
    %c0_i32 = arith.constant 0 : i32
    %c0_i32_0 = arith.constant 0 : i32
    %c0_i32_1 = arith.constant 0 : i32
    return %c0_i32, %c0_i32_0 : i32, i32
  }
  func.func @transform_4(%arg0: i32, %arg1: i32, %arg2: memref<1xi32, #tpu.memory_space<smem>>, %arg3: memref<1xi32, #tpu.memory_space<smem>>) -> (i32, i32) {
    %c0_i32 = arith.constant 0 : i32
    %c0_i32_0 = arith.constant 0 : i32
    %c0_i32_1 = arith.constant 0 : i32
    return %c0_i32, %c0_i32_0 : i32, i32
  }
  func.func @transform_5(%arg0: i32, %arg1: i32, %arg2: memref<1xi32, #tpu.memory_space<smem>>, %arg3: memref<1xi32, #tpu.memory_space<smem>>) -> (i32, i32) {
    %c0_i32 = arith.constant 0 : i32
    %c0_i32_0 = arith.constant 0 : i32
    %c0_i32_1 = arith.constant 0 : i32
    return %c0_i32, %c0_i32_0 : i32, i32
  }
  func.func @transform_6(%arg0: i32, %arg1: i32, %arg2: memref<1xi32, #tpu.memory_space<smem>>, %arg3: memref<1xi32, #tpu.memory_space<smem>>) -> (i32, i32) {
    %c0_i32 = arith.constant 0 : i32
    %c0_i32_0 = arith.constant 0 : i32
    %c0_i32_1 = arith.constant 0 : i32
    return %c0_i32, %c0_i32_0 : i32, i32
  }
  func.func @transform_7(%arg0: i32, %arg1: i32, %arg2: memref<1xi32, #tpu.memory_space<smem>>, %arg3: memref<1xi32, #tpu.memory_space<smem>>) -> (i32, i32) {
    %c0_i32 = arith.constant 0 : i32
    %c0_i32_0 = arith.constant 0 : i32
    %c0_i32_1 = arith.constant 0 : i32
    return %c0_i32, %c0_i32_0 : i32, i32
  }
  func.func @transform_8(%arg0: i32, %arg1: i32, %arg2: memref<1xi32, #tpu.memory_space<smem>>, %arg3: memref<1xi32, #tpu.memory_space<smem>>) -> (i32, i32) {
    %c0_i32 = arith.constant 0 : i32
    %c0_i32_0 = arith.constant 0 : i32
    %c0_i32_1 = arith.constant 0 : i32
    return %c0_i32, %c0_i32_0 : i32, i32
  }
  func.func @transform_9(%arg0: i32, %arg1: i32, %arg2: memref<1xi32, #tpu.memory_space<smem>>, %arg3: memref<1xi32, #tpu.memory_space<smem>>) -> (i32, i32) {
    %c0_i32 = arith.constant 0 : i32
    %c0_i32_0 = arith.constant 0 : i32
    %c0_i32_1 = arith.constant 0 : i32
    return %c0_i32, %c0_i32_0 : i32, i32
  }
  func.func @transform_10(%arg0: i32, %arg1: i32, %arg2: memref<1xi32, #tpu.memory_space<smem>>, %arg3: memref<1xi32, #tpu.memory_space<smem>>) -> (i32, i32) {
    %c0_i32 = arith.constant 0 : i32
    %c0_i32_0 = arith.constant 0 : i32
    %c0_i32_1 = arith.constant 0 : i32
    return %c0_i32, %c0_i32_0 : i32, i32
  }
  func.func @transform_11(%arg0: i32, %arg1: i32, %arg2: memref<1xi32, #tpu.memory_space<smem>>, %arg3: memref<1xi32, #tpu.memory_space<smem>>) -> (i32, i32) {
    %c0_i32 = arith.constant 0 : i32
    %c0_i32_0 = arith.constant 0 : i32
    %c0_i32_1 = arith.constant 0 : i32
    return %c0_i32, %c0_i32_0 : i32, i32
  }
  func.func @transform_12(%arg0: i32, %arg1: i32, %arg2: memref<1xi32, #tpu.memory_space<smem>>, %arg3: memref<1xi32, #tpu.memory_space<smem>>) -> (i32, i32) {
    %c0_i32 = arith.constant 0 : i32
    %c0_i32_0 = arith.constant 0 : i32
    %c0_i32_1 = arith.constant 0 : i32
    return %c0_i32, %c0_i32_0 : i32, i32
  }
  func.func @transform_13(%arg0: i32, %arg1: i32, %arg2: memref<1xi32, #tpu.memory_space<smem>>, %arg3: memref<1xi32, #tpu.memory_space<smem>>) -> (i32, i32) {
    %c0_i32 = arith.constant 0 : i32
    %c0_i32_0 = arith.constant 0 : i32
    %c0_i32_1 = arith.constant 0 : i32
    return %c0_i32, %c0_i32_0 : i32, i32
  }
  func.func @transform_14(%arg0: i32, %arg1: i32, %arg2: memref<1xi32, #tpu.memory_space<smem>>, %arg3: memref<1xi32, #tpu.memory_space<smem>>) -> (i32, i32) {
    %c0_i32 = arith.constant 0 : i32
    %c0_i32_0 = arith.constant 0 : i32
    %c0_i32_1 = arith.constant 0 : i32
    return %c0_i32, %c0_i32_0 : i32, i32
  }
  func.func @transform_15(%arg0: i32, %arg1: i32, %arg2: memref<1xi32, #tpu.memory_space<smem>>, %arg3: memref<1xi32, #tpu.memory_space<smem>>) -> (i32, i32) {
    %c0_i32 = arith.constant 0 : i32
    %c0_i32_0 = arith.constant 0 : i32
    %c0_i32_1 = arith.constant 0 : i32
    return %c0_i32, %c0_i32_0 : i32, i32
  }
  func.func @transform_16(%arg0: i32, %arg1: i32, %arg2: memref<1xi32, #tpu.memory_space<smem>>, %arg3: memref<1xi32, #tpu.memory_space<smem>>) -> (i32, i32) {
    %c0_i32 = arith.constant 0 : i32
    %c0_i32_0 = arith.constant 0 : i32
    return %arg0, %c0_i32 : i32, i32
  }
}

</mosaic_0001>

<bundles_post_ra>
// kernel: _decoder_compute.1
= control target key start
LH: loop header
LB: loop body
LE: loop exit
PB: predicated region body
PF: predicated region fallthrough
CT: control target
= control target key end

     0   :  { %vm128_vm0 = vcmask 130048   ;;  %v1884_v0 = vmov 0.0   ;;  %s2473_s0 = inlined_call_operand.<no memory space> [shape: s32[1], index: 0, kind: input, shape index: {}]   ;;  %s2474_s1 = inlined_call_operand.<no memory space> [shape: s32[1], index: 1, kind: input, shape index: {}]   ;;  %s2475_s4 = inlined_call_operand.vmem [shape: f32[32,16], index: 4, kind: input, shape index: {}]   ;;  %s2476_s5 = inlined_call_operand.vmem [shape: bf16[40,32], index: 5, kind: input, shape index: {}]   ;;  %s2477_s6 = inlined_call_operand.vmem [shape: f32[1,32], index: 6, kind: input, shape index: {}]   ;;  %s2478_s7 = inlined_call_operand.vmem [shape: bf16[32,16], index: 7, kind: input, shape index: {}]   ;;  %s2479_s8 = inlined_call_operand.vmem [shape: f32[1,16], index: 8, kind: input, shape index: {}]   ;;  %s2480_s9 = inlined_call_operand.vmem [shape: f32[1,16], index: 9, kind: input, shape index: {}]   ;;  %s2481_s10 = inlined_call_operand.vmem [shape: f32[1,16], index: 10, kind: input, shape index: {}]   ;;  %s2482_s11 = inlined_call_operand.vmem [shape: f32[16,32], index: 11, kind: input, shape index: {}]   ;;  %s2483_s12 = inlined_call_operand.vmem [shape: f32[16,32], index: 12, kind: input, shape index: {}]   ;;  %s2484_s13 = inlined_call_operand.vmem [shape: f32[1,32], index: 13, kind: input, shape index: {}]   ;;  %s2485_s14 = inlined_call_operand.vmem [shape: f32[32,16], index: 14, kind: input, shape index: {}]   ;;  %s2486_s15 = inlined_call_operand.vmem [shape: f32[1,16], index: 15, kind: input, shape index: {}]   ;;  %s2487_s16 = inlined_call_operand.vmem [shape: f32[1,16], index: 16, kind: input, shape index: {}]   ;;  %s2488_s17 = inlined_call_operand.vmem [shape: f32[1,16], index: 17, kind: input, shape index: {}]   ;;  %s2489_s18 = inlined_call_operand.vmem [shape: f32[32,16], index: 18, kind: output, shape index: {}]   ;;  %s2490_s2 = inlined_call_operand.vmem [shape: s32[1,128], index: 2, kind: input, shape index: {}]   ;;  %s2491_s3 = inlined_call_operand.vmem [shape: bf16[128,40], index: 3, kind: input, shape index: {}]  }
   0x1   :  { %2495 = sst [smem:[#allocation6_spill]] %s2473_s0  ;;  %129 = vst.msk [vmem:[#allocation2] sm:$0xff] %vm128_vm0, %v1884_v0  ;;  %130 = vst.msk [vmem:[#allocation2 + $0x8] sm:$0xff] %vm128_vm0, %v1884_v0 }
   0x2   :  { %2496 = sst [smem:[#allocation7_spill]] %s2474_s1  ;;  %s2499_s29 = sld [smem:[#allocation6_spill]]  ;;  %131 = vst.msk [vmem:[#allocation2 + $0x10] sm:$0xff] %vm128_vm0, %v1884_v0  ;;  %132 = vst.msk [vmem:[#allocation2 + $0x18] sm:$0xff] %vm128_vm0, %v1884_v0 }
   0x3   :  { %2497 = sst [smem:[#allocation8_spill]] %s2475_s4  ;;  %s2500_s28 = sld [smem:[#allocation7_spill]] }
   0x4   :  { %2498 = sst [smem:[#allocation9_spill]] %s2489_s18 }
   0x8   :  { %p100_p0 = scmp.lt.s32.totalorder %s2499_s29, 0 }
   0x9   :  { %p1446_p2 = scmp.le.s32.totalorder %s2500_s28, 0 }
   0xa   :  { %s2504_s29 = smov (!%p100_p0, %s2499_s29), 0  ;;  %v1751_v1 = vld [vmem:[%s2476_s5] sm:$0xff] (!%p1446_p2)   ;;  %v1752_v2 = vld [vmem:[%s2476_s5 + $0x8] sm:$0xff] (!%p1446_p2)   ;;  %vm221_vm1 = vcmask (!%p1446_p2), 326656   ;;  %v1753_v4 = vld [vmem:[%s2476_s5 + $0x10] ss:$0 sps:$4 sm:$0xff] (!%p1446_p2)  }
   0xb   :  { %s1991_s19 = scalar_select %p100_p0, %s2504_s29, 0 }
   0xc   :  { %s1443_s1 = sshll.u32 %s2504_s29, 4  ;;  %137 = sbr.rel (%p1446_p2) target bundleno = 1058 (0x422), region = 73  ;;  %1582 = vmatprep.subr.bf16.mxu0 (!%p1446_p2), %v1751_v1  ;;  %vm246_vm2 = vcmask (!%p1446_p2), 1043456   ;;  %v1762_v13 = vld [vmem:[%s2478_s7] sm:$0xff] (!%p1446_p2)   ;;  %v1763_v14 = vld [vmem:[%s2478_s7 + $0x8] sm:$0xff] (!%p1446_p2)   ;;  %vm490_vm3 = vcmask (!%p1446_p2), 261120  }
   0xd   :  { %s104_s22 = scalar_lea.vmem %s2490_s2, %s1991_s19  ;;  %p114_p1 = scmp.lt.s32.totalorder %s1443_s1, 15  ;;  %1583 = vmatpush3.bf16.msra.mxu0 (!%p1446_p2), %v1751_v1  ;;  %v248_v5 = vsel (!%p1446_p2), %vm246_vm2, %v1753_v4, 0  ;;  %1604 = vmatprep.subr.bf16.mxu1 (!%p1446_p2), %v1762_v13  ;;  %v2029_v15 = vld [vmem:[%s2477_s6] ss:$0 sm:$0xff] (!%p1446_p2) }
   0xe   :  { %1584 = vmatprep.subr.bf16.mxu0 (!%p1446_p2), %v1752_v2  ;;  %1605 = vmatpush3.bf16.msra.mxu1 (!%p1446_p2), %v1762_v13 }
   0xf   :  { %s2506_s1 = smov (!%p114_p1, %s1443_s1), 15  ;;  %1606 = vmatprep.subr.bf16.mxu1 (!%p1446_p2), %v1763_v14 }
  0x10   :  { %s1444_s4 = sshll.u32 %s2506_s1, 2 }
  0x11   :  { %s117_s25 = scalar_lea.vmem %s2491_s3, %s1444_s4  ;;  %1585 = vmatpush3.bf16.msra.mxu0 (!%p1446_p2), %v1752_v2 }
  0x12   :  { %v1754_v3 = vld [vmem:[%s117_s25] sm:$0xff] (!%p1446_p2)   ;;  %1748 = vmatprep.subr.msk.bf16.mxu0 (!%p1446_p2), %vm246_vm2, %v1753_v4  ;;  %v1755_v6 = vld [vmem:[%s117_s25 + $0x8] sm:$0xff] (!%p1446_p2)   ;;  %v1756_v7 = vld [vmem:[%s117_s25 + $0x10] sm:$0xff] (!%p1446_p2)   ;;  %1607 = vmatpush3.bf16.msra.mxu1 (!%p1446_p2), %v1763_v14 }
  0x13   :  { %1588 = vmatprep.mubr.msk.bf16.mxu0 %vm221_vm1, %v1754_v3  ;;  %v1757_v8 = vld [vmem:[%s117_s25 + $0x18] sm:$0xff]   ;;  %v1758_v9 = vld [vmem:[%s117_s25 + $0x20] sm:$0xff]   ;;  %v1759_v10 = vld [vmem:[%s117_s25 + $0x28] sm:$0xff]  }
  0x14   :  { %v1760_v11 = vld [vmem:[%s117_s25 + $0x30] sm:$0xff]   ;;  %v1761_v12 = vld [vmem:[%s117_s25 + $0x38] sm:$0xff]  }
  0x15   :  { %1587 = vmatpush3.bf16.msra.mxu0 %v248_v5 }
  0x18   :  { %1589 = vmatmul.mubr.msk.bf16.vlgmr.msra.gmra.mrb[0].mxu0 %vm221_vm1, %v1755_v6 }
  0x19   :  { %1592 = vmatprep.mubr.msk.bf16.mxu0 %vm221_vm1, %v1756_v7 }
  0x20   :  { %1593 = vmatmul.mubr.msk.bf16.gmra.mrb[4].mxu0 %vm221_vm1, %v1757_v8 }
  0x21   :  { %1596 = vmatprep.mubr.msk.bf16.mxu0 %vm221_vm1, %v1758_v9 }
  0x28   :  { %1597 = vmatmul.mubr.msk.bf16.gmra.mrb[8].mxu0 %vm221_vm1, %v1759_v10 }
  0x29   :  { %1600 = vmatprep.mubr.msk.bf16.mxu0 %vm221_vm1, %v1760_v11 }
  0x30   :  { %1601 = vmatmul.mubr.msk.bf16.gmra.mrb[12].mxu0 %vm221_vm1, %v1761_v12 }
  0xeb   :  { %v1590_v16 = vpop.f32.mrb[0].mxu0 }
  0xec   :  { %v2032_v17 = vadd.f32 %v1590_v16, %v2029_v15  ;;  %v284_v18 = vpop.f32.mrb[1].mxu0 }
  0xed   :  { %v2035_v19 = vadd.f32 %v2029_v15, %v284_v18  ;;  %v1591_v20 = vpop.f32.mrb[2].mxu0 }
  0xee   :  { %v1469_v21 = vmul.f32 -1.442695, %v2032_v17  ;;  %v2039_v22 = vadd.f32 %v1591_v20, %v2029_v15  ;;  %v287_v23 = vpop.f32.mrb[3].mxu0 }
  0xef   :  { %v1467_v24 = vmul.f32 -1.442695, %v2035_v19  ;;  %v2043_v25 = vadd.f32 %v2029_v15, %v287_v23 }
  0xf0   :  { %1764 = vpow2.f32 %v1469_v21  ;;  %v1470_v26 = vmul.f32 -1.442695, %v2039_v22 }
  0xf1   :  { %1766 = vpow2.f32 %v1467_v24  ;;  %v1468_v27 = vmul.f32 -1.442695, %v2043_v25 }
  0xf2   :  { %1768 = vpow2.f32 %v1470_v26 }
  0xf3   :  { %1770 = vpow2.f32 %v1468_v27  ;;  %v1594_v28 = vpop.f32.mrb[4].mxu0 }
  0xf4   :  { %v2048_v29 = vadd.f32 %v1594_v28, %v2029_v15  ;;  %v300_v30 = vpop.f32.mrb[5].mxu0 }
  0xf5   :  { %v2051_v31 = vadd.f32 %v2029_v15, %v300_v30  ;;  %v1595_v32 = vpop.f32.mrb[6].mxu0 }
  0xf6   :  { %v1473_v33 = vmul.f32 -1.442695, %v2048_v29  ;;  %v2055_v34 = vadd.f32 %v1595_v32, %v2029_v15  ;;  %v303_v35 = vpop.f32.mrb[7].mxu0 }
  0xf7   :  { %v1471_v36 = vmul.f32 -1.442695, %v2051_v31  ;;  %v2059_v37 = vadd.f32 %v2029_v15, %v303_v35 }
  0xf8   :  { %1772 = vpow2.f32 %v1473_v33  ;;  %v1474_v38 = vmul.f32 -1.442695, %v2055_v34 }
  0xf9   :  { %1774 = vpow2.f32 %v1471_v36  ;;  %v1472_v39 = vmul.f32 -1.442695, %v2059_v37 }
  0xfa   :  { %v1765_v40 = vpop.eup %1764  ;;  %1776 = vpow2.f32 %v1474_v38 }
  0xfb   :  { %v1767_v41 = vpop.eup %1766  ;;  %v397_v42 = vadd.f32 1.0, %v1765_v40  ;;  %1778 = vpow2.f32 %v1472_v39  ;;  %v1598_v43 = vpop.f32.mrb[8].mxu0 }
  0xfc   :  { %v1769_v44 = vpop.eup %1768  ;;  %v395_v45 = vadd.f32 1.0, %v1767_v41  ;;  %v2064_v46 = vadd.f32 %v1598_v43, %v2029_v15  ;;  %v316_v47 = vpop.f32.mrb[9].mxu0 }
  0xfd   :  { %v1771_v48 = vpop.eup %1770  ;;  %1780 = vrcp.f32 %v397_v42  ;;  %v398_v49 = vadd.f32 1.0, %v1769_v44  ;;  %v2067_v50 = vadd.f32 %v2029_v15, %v316_v47  ;;  %v1599_v51 = vpop.f32.mrb[10].mxu0 }
  0xfe   :  { %1782 = vrcp.f32 %v395_v45  ;;  %v396_v52 = vadd.f32 1.0, %v1771_v48  ;;  %v1477_v53 = vmul.f32 -1.442695, %v2064_v46  ;;  %v2071_v54 = vadd.f32 %v1599_v51, %v2029_v15  ;;  %v319_v55 = vpop.f32.mrb[11].mxu0 }
  0xff   :  { %1784 = vrcp.f32 %v398_v49  ;;  %v1475_v56 = vmul.f32 -1.442695, %v2067_v50  ;;  %v2075_v57 = vadd.f32 %v2029_v15, %v319_v55 }
 0x100   :  { %1786 = vrcp.f32 %v396_v52  ;;  %v1478_v58 = vmul.f32 -1.442695, %v2071_v54 }
 0x101   :  { %1788 = vpow2.f32 %v1477_v53  ;;  %v1476_v59 = vmul.f32 -1.442695, %v2075_v57 }
 0x102   :  { %v1773_v60 = vpop.eup %1772  ;;  %1790 = vpow2.f32 %v1475_v56 }
 0x103   :  { %v1775_v61 = vpop.eup %1774  ;;  %v401_v62 = vadd.f32 1.0, %v1773_v60  ;;  %1792 = vpow2.f32 %v1478_v58  ;;  %v1602_v63 = vpop.f32.mrb[12].mxu0 }
 0x104   :  { %v1777_v0 = vpop.eup %1776  ;;  %v399_v1 = vadd.f32 1.0, %v1775_v61  ;;  %1794 = vpow2.f32 %v1476_v59  ;;  %v2080_v2 = vadd.f32 %v1602_v63, %v2029_v15  ;;  %v332_v3 = vpop.f32.mrb[13].mxu0 }
 0x105   :  { %v1779_v4 = vpop.eup %1778  ;;  %1796 = vrcp.f32 %v401_v62  ;;  %v402_v5 = vadd.f32 1.0, %v1777_v0  ;;  %v2083_v6 = vadd.f32 %v2029_v15, %v332_v3  ;;  %v1603_v7 = vpop.f32.mrb[14].mxu0 }
 0x106   :  { %1798 = vrcp.f32 %v399_v1  ;;  %v400_v8 = vadd.f32 1.0, %v1779_v4  ;;  %v1481_v9 = vmul.f32 -1.442695, %v2080_v2  ;;  %v2087_v10 = vadd.f32 %v1603_v7, %v2029_v15  ;;  %v335_v11 = vpop.f32.mrb[15].mxu0 }
 0x107   :  { %v1781_v12 = vpop.eup %1780  ;;  %1800 = vrcp.f32 %v402_v5  ;;  %v1479_v13 = vmul.f32 -1.442695, %v2083_v6  ;;  %v2091_v14 = vadd.f32 %v2029_v15, %v335_v11  ;;  %v1483_v11 = vld [vmem:[%s2479_s8] ss:$0 sm:$0xff] }
 0x108   :  { %v1783_v16 = vpop.eup %1782  ;;  %1802 = vrcp.f32 %v400_v8  ;;  %v1482_v18 = vmul.f32 -1.442695, %v2087_v10  ;;  %v445_v24 = vmul.f32 %v1781_v12, %v2032_v17 }
 0x109   :  { %v1785_v20 = vpop.eup %1784  ;;  %1804 = vpow2.f32 %v1481_v9  ;;  %v1480_v21 = vmul.f32 -1.442695, %v2091_v14  ;;  %v443_v28 = vmul.f32 %v1783_v16, %v2035_v19 }
 0x10a   :  { %v1787_v23 = vpop.eup %1786  ;;  %v446_v26 = vmul.f32 %v1785_v20, %v2039_v22  ;;  %1806 = vpow2.f32 %v1479_v13 }
 0x10b   :  { %v1789_v27 = vpop.eup %1788  ;;  %v444_v15 = vmul.f32 %v1787_v23, %v2043_v25  ;;  %1808 = vpow2.f32 %v1482_v18 }
 0x10c   :  { %v1791_v30 = vpop.eup %1790  ;;  %v460_v32 = vpack.c.bf16 %v446_v26, %v445_v24  ;;  %v405_v33 = vadd.f32 1.0, %v1789_v27  ;;  %1810 = vpow2.f32 %v1480_v21 }
 0x10d   :  { %v1793_v35 = vpop.eup %1792  ;;  %v403_v36 = vadd.f32 1.0, %v1791_v30  ;;  %v459_v38 = vpack.c.bf16 %v444_v15, %v443_v28 }
 0x10e   :  { %v1795_v39 = vpop.eup %1794  ;;  %1812 = vrcp.f32 %v405_v33  ;;  %v406_v17 = vadd.f32 1.0, %v1793_v35 }
 0x10f   :  { %v1797_v40 = vpop.eup %1796  ;;  %1814 = vrcp.f32 %v403_v36  ;;  %v404_v22 = vadd.f32 1.0, %v1795_v39  ;;  %1608 = vmatprep.mubr.msk.bf16.mxu1 %vm490_vm3, %v459_v38 }
 0x110   :  { %v1799_v19 = vpop.eup %1798  ;;  %1816 = vrcp.f32 %v406_v17  ;;  %1609 = vmatmul.mubr.msk.bf16.vlgmr.msra.gmra.mrb[0].mxu1 %vm490_vm3, %v460_v32  ;;  %v449_v42 = vmul.f32 %v1797_v40, %v2048_v29 }
 0x111   :  { %v1801_v25 = vpop.eup %1800  ;;  %1818 = vrcp.f32 %v404_v22  ;;  %v447_v45 = vmul.f32 %v1799_v19, %v2051_v31 }
 0x112   :  { %v1803_v41 = vpop.eup %1802  ;;  %v450_v43 = vmul.f32 %v1801_v25, %v2055_v34 }
 0x113   :  { %v1805_v44 = vpop.eup %1804  ;;  %v448_v47 = vmul.f32 %v1803_v41, %v2059_v37 }
 0x114   :  { %v1807_v48 = vpop.eup %1806  ;;  %v462_v49 = vpack.c.bf16 %v450_v43, %v449_v42  ;;  %v409_v51 = vadd.f32 1.0, %v1805_v44 }
 0x115   :  { %v1809_v52 = vpop.eup %1808  ;;  %v461_v53 = vpack.c.bf16 %v448_v47, %v447_v45  ;;  %v407_v55 = vadd.f32 1.0, %v1807_v48 }
 0x116   :  { %v1811_v56 = vpop.eup %1810  ;;  %1820 = vrcp.f32 %v409_v51  ;;  %v410_v58 = vadd.f32 1.0, %v1809_v52 }
 0x117   :  { %1822 = vrcp.f32 %v407_v55  ;;  %v408_v59 = vadd.f32 1.0, %v1811_v56  ;;  %1612 = vmatprep.mubr.msk.bf16.mxu1 %vm490_vm3, %v461_v53 }
 0x118   :  { %v1813_v29 = vpop.eup %1812  ;;  %1824 = vrcp.f32 %v410_v58  ;;  %1613 = vmatmul.mubr.msk.bf16.gmra.mrb[4].mxu1 %vm490_vm3, %v462_v49 }
 0x119   :  { %v1815_v31 = vpop.eup %1814  ;;  %1826 = vrcp.f32 %v408_v59  ;;  %v453_v60 = vmul.f32 %v1813_v29, %v2064_v46 }
 0x11a   :  { %v1817_v34 = vpop.eup %1816  ;;  %v451_v62 = vmul.f32 %v1815_v31, %v2067_v50 }
 0x11b   :  { %v1819_v37 = vpop.eup %1818  ;;  %v454_v61 = vmul.f32 %v1817_v34, %v2071_v54 }
 0x11c   :  { %v452_v63 = vmul.f32 %v1819_v37, %v2075_v57 }
 0x11d   :  { %v464_v0 = vpack.c.bf16 %v454_v61, %v453_v60 }
 0x11e   :  { %v463_v1 = vpack.c.bf16 %v452_v63, %v451_v62 }
 0x120   :  { %v1821_v3 = vpop.eup %1820  ;;  %1616 = vmatprep.mubr.msk.bf16.mxu1 %vm490_vm3, %v463_v1 }
 0x121   :  { %v1823_v4 = vpop.eup %1822  ;;  %1617 = vmatmul.mubr.msk.bf16.gmra.mrb[8].mxu1 %vm490_vm3, %v464_v0  ;;  %v457_v8 = vmul.f32 %v1821_v3, %v2080_v2 }
 0x122   :  { %v1825_v5 = vpop.eup %1824  ;;  %v455_v54 = vmul.f32 %v1823_v4, %v2083_v6 }
 0x123   :  { %v1827_v7 = vpop.eup %1826  ;;  %v458_v46 = vmul.f32 %v1825_v5, %v2087_v10 }
 0x124   :  { %v456_v50 = vmul.f32 %v1827_v7, %v2091_v14 }
 0x125   :  { %v466_v9 = vpack.c.bf16 %v458_v46, %v457_v8 }
 0x126   :  { %v465_v57 = vpack.c.bf16 %v456_v50, %v455_v54 }
 0x128   :  { %1620 = vmatprep.mubr.msk.bf16.mxu1 %vm490_vm3, %v465_v57 }
 0x129   :  { %1621 = vmatmul.mubr.msk.bf16.gmra.mrb[12].mxu1 %vm490_vm3, %v466_v9 }
 0x1e3   :  { %v1610_v12 = vpop.f32.mrb[0].mxu1 }
 0x1e4   :  { %v2122_v13 = vadd.f32 %v1610_v12, %v1483_v11  ;;  %v549_v2 = vpop.f32.mrb[1].mxu1 }
 0x1e5   :  { %v2124_v16 = vadd.f32 %v1483_v11, %v549_v2  ;;  %v1611_v10 = vpop.f32.mrb[2].mxu1 }
 0x1e6   :  { %v2126_v6 = vadd.f32 %v1611_v10, %v1483_v11  ;;  %v552_v14 = vpop.f32.mrb[3].mxu1  ;;  %v621_v18 = vsel %vm128_vm0, %v2122_v13, 0.0 }
 0x1e7   :  { %v2130_v20 = vadd.f32 %v1483_v11, %v552_v14  ;;  %622 = vadd.xlane.f32.xlu1 %v621_v18  ;;  %v615_v21 = vsel %vm128_vm0, %v2124_v16, 0.0 }
 0x1e8   :  { %616 = vadd.xlane.f32.xlu0 %v615_v21  ;;  %v624_v23 = vsel %vm128_vm0, %v2126_v6, 0.0 }
 0x1e9   :  { %v618_v26 = vsel %vm128_vm0, %v2130_v20, 0.0 }
 0x1eb   :  { %625 = vadd.xlane.f32.xlu1 %v624_v23  ;;  %v1614_v24 = vpop.f32.mrb[4].mxu1 }
 0x1ec   :  { %v565_v27 = vpop.f32.mrb[5].mxu1  ;;  %619 = vadd.xlane.f32.xlu0 %v618_v26  ;;  %v2140_v32 = vadd.f32 %v1614_v24, %v1483_v11 }
 0x1ed   :  { %v2138_v28 = vadd.f32 %v1483_v11, %v565_v27  ;;  %v1615_v15 = vpop.f32.mrb[6].mxu1 }
 0x1ee   :  { %v568_v30 = vpop.f32.mrb[7].mxu1  ;;  %v2146_v36 = vadd.f32 %v1615_v15, %v1483_v11  ;;  %v633_v39 = vsel %vm128_vm0, %v2140_v32, 0.0 }
 0x1ef   :  { %v2142_v33 = vadd.f32 %v1483_v11, %v568_v30  ;;  %v627_v35 = vsel %vm128_vm0, %v2138_v28, 0.0 }
 0x1f0   :  { %628 = vadd.xlane.f32.xlu0 %v627_v35  ;;  %v636_v22 = vsel %vm128_vm0, %v2146_v36, 0.0 }
 0x1f1   :  { %v630_v38 = vsel %vm128_vm0, %v2142_v33, 0.0 }
 0x1f2   :  { %631 = vadd.xlane.f32.xlu1 %v630_v38 }
 0x1f4   :  { %v1618_v17 = vpop.f32.mrb[8].mxu1  ;;  %634 = vadd.xlane.f32.xlu0 %v633_v39 }
 0x1f5   :  { %v581_v40 = vpop.f32.mrb[9].mxu1  ;;  %v2156_v42 = vadd.f32 %v1618_v17, %v1483_v11 }
 0x1f6   :  { %v2154_v19 = vadd.f32 %v1483_v11, %v581_v40  ;;  %v1619_v25 = vpop.f32.mrb[10].mxu1  ;;  %637 = vadd.xlane.f32.xlu1 %v636_v22 }
 0x1f7   :  { %v584_v41 = vpop.f32.mrb[11].mxu1  ;;  %v2162_v45 = vadd.f32 %v1619_v25, %v1483_v11  ;;  %v645_v49 = vsel %vm128_vm0, %v2156_v42, 0.0 }
 0x1f8   :  { %v2158_v43 = vadd.f32 %v1483_v11, %v584_v41  ;;  %v639_v44 = vsel %vm128_vm0, %v2154_v19, 0.0 }
 0x1f9   :  { %640 = vadd.xlane.f32.xlu0 %v639_v44  ;;  %v648_v55 = vsel %vm128_vm0, %v2162_v45, 0.0 }
 0x1fa   :  { %v642_v47 = vsel %vm128_vm0, %v2158_v43, 0.0 }
 0x1fb   :  { %643 = vadd.xlane.f32.xlu1 %v642_v47 }
 0x1fc   :  { %v1622_v48 = vpop.f32.mrb[12].mxu1 }
 0x1fd   :  { %v597_v51 = vpop.f32.mrb[13].mxu1  ;;  %646 = vadd.xlane.f32.xlu0 %v645_v49  ;;  %v2172_v58 = vadd.f32 %v1622_v48, %v1483_v11 }
 0x1fe   :  { %v2168_v52 = vadd.f32 %v1483_v11, %v597_v51  ;;  %v1623_v53 = vpop.f32.mrb[14].mxu1 }
 0x1ff   :  { %v600_v56 = vpop.f32.mrb[15].mxu1  ;;  %649 = vadd.xlane.f32.xlu1 %v648_v55  ;;  %v2178_v31 = vadd.f32 %v1623_v53, %v1483_v11  ;;  %v657_v37 = vsel %vm128_vm0, %v2172_v58, 0.0 }
 0x200   :  { %v2174_v59 = vadd.f32 %v1483_v11, %v600_v56  ;;  %v651_v29 = vsel %vm128_vm0, %v2168_v52, 0.0 }
 0x201   :  { %652 = vadd.xlane.f32.xlu0 %v651_v29  ;;  %v660_v60 = vsel %vm128_vm0, %v2178_v31, 0.0 }
 0x202   :  { %v654_v34 = vsel %vm128_vm0, %v2174_v59, 0.0 }
 0x203   :  { %655 = vadd.xlane.f32.xlu1 %v654_v34 }
 0x205   :  { %658 = vadd.xlane.f32.xlu0 %v657_v37 }
 0x207   :  { %661 = vadd.xlane.f32.xlu1 %v660_v60 }
 0x274   :  { %v623_v61 = vpop.xlane.xlu1 %622 }
 0x275   :  { %v666_v62 = vmul.f32 0.0625, %v623_v61  ;;  %v617_v63 = vpop.xlane.xlu0 %616 }
 0x276   :  { %v664_v0 = vmul.f32 0.0625, %v617_v63 }
 0x277   :  { %v2187_v1 = vsub.f32 %v2122_v13, %v666_v62 }
 0x278   :  { %v2190_v3 = vsub.f32 %v2124_v16, %v664_v0  ;;  %v626_v4 = vpop.xlane.xlu1 %625 }
 0x279   :  { %v667_v5 = vmul.f32 0.0625, %v626_v4  ;;  %v620_v7 = vpop.xlane.xlu0 %619  ;;  %v698_v57 = vmul.f32 %v2187_v1, %v2187_v1 }
 0x27a   :  { %v665_v8 = vmul.f32 0.0625, %v620_v7  ;;  %v696_v46 = vmul.f32 %v2190_v3, %v2190_v3 }
 0x27b   :  { %v2195_v54 = vsub.f32 %v2126_v6, %v667_v5  ;;  %v718_v14 = vsel %vm128_vm0, %v698_v57, 0.0 }
 0x27c   :  { %v2198_v50 = vsub.f32 %v2130_v20, %v665_v8  ;;  %v712_v9 = vsel %vm128_vm0, %v696_v46, 0.0 }
 0x27d   :  { %713 = vadd.xlane.f32.xlu0 %v712_v9  ;;  %v629_v11 = vpop.xlane.xlu0 %628  ;;  %v699_v16 = vmul.f32 %v2195_v54, %v2195_v54 }
 0x27e   :  { %v668_v12 = vmul.f32 0.0625, %v629_v11  ;;  %v697_v13 = vmul.f32 %v2198_v50, %v2198_v50 }
 0x27f   :  { %v632_v2 = vpop.xlane.xlu1 %631  ;;  %v721_v27 = vsel %vm128_vm0, %v699_v16, 0.0 }
 0x280   :  { %v2208_v10 = vsub.f32 %v2138_v28, %v668_v12  ;;  %v669_v6 = vmul.f32 0.0625, %v632_v2  ;;  %v715_v18 = vsel %vm128_vm0, %v697_v13, 0.0 }
 0x281   :  { %719 = vadd.xlane.f32.xlu0 %v718_v14  ;;  %716 = vadd.xlane.f32.xlu1 %v715_v18  ;;  %v635_v20 = vpop.xlane.xlu0 %634  ;;  %v872_v14 = vlaneseq }
 0x282   :  { %v2213_v21 = vsub.f32 %v2142_v33, %v669_v6  ;;  %v670_v23 = vmul.f32 0.0625, %v635_v20  ;;  %v700_v24 = vmul.f32 %v2208_v10, %v2208_v10 }
 0x283   :  { %v638_v26 = vpop.xlane.xlu1 %637  ;;  %v873_v18 = vshrl.u32 %v872_v14, 7 }
 0x284   :  { %v2219_v28 = vsub.f32 %v2140_v32, %v670_v23  ;;  %v671_v15 = vmul.f32 0.0625, %v638_v26  ;;  %v724_v30 = vsel %vm128_vm0, %v700_v24, 0.0  ;;  %v701_v35 = vmul.f32 %v2213_v21, %v2213_v21 }
 0x285   :  { %722 = vadd.xlane.f32.xlu1 %v721_v27  ;;  %725 = vadd.xlane.f32.xlu0 %v724_v30  ;;  %v2290_v20 = vadd.s32 8, %v873_v18  ;;  %v1885_v23 = vmov 1.0   ;;  %v2295_v24 = vadd.s32 16, %v873_v18  ;;  %v2297_v26 = vadd.s32 24, %v873_v18 }
 0x286   :  { %v2225_v33 = vsub.f32 %v2146_v36, %v671_v15  ;;  %v641_v38 = vpop.xlane.xlu0 %640  ;;  %v702_v39 = vmul.f32 %v2219_v28, %v2219_v28  ;;  %v727_v32 = vsel %vm128_vm0, %v701_v35, 0.0 }
 0x287   :  { %v672_v17 = vmul.f32 0.0625, %v641_v38 }
 0x288   :  { %v644_v40 = vpop.xlane.xlu1 %643  ;;  %v730_v22 = vsel %vm128_vm0, %v702_v39, 0.0  ;;  %v703_v25 = vmul.f32 %v2225_v33, %v2225_v33 }
 0x289   :  { %v2234_v41 = vsub.f32 %v2154_v19, %v672_v17  ;;  %v673_v44 = vmul.f32 0.0625, %v644_v40  ;;  %728 = vadd.xlane.f32.xlu1 %v727_v32  ;;  %731 = vadd.xlane.f32.xlu0 %v730_v22 }
 0x28a   :  { %v647_v36 = vpop.xlane.xlu0 %646  ;;  %v733_v53 = vsel %vm128_vm0, %v703_v25, 0.0 }
 0x28b   :  { %v2237_v47 = vsub.f32 %v2158_v43, %v673_v44  ;;  %v674_v48 = vmul.f32 0.0625, %v647_v36  ;;  %v704_v49 = vmul.f32 %v2234_v41, %v2234_v41 }
 0x28c   :  { %v650_v51 = vpop.xlane.xlu1 %649 }
 0x28d   :  { %v2243_v55 = vsub.f32 %v2156_v42, %v674_v48  ;;  %v675_v56 = vmul.f32 0.0625, %v650_v51  ;;  %734 = vadd.xlane.f32.xlu1 %v733_v53  ;;  %v736_v19 = vsel %vm128_vm0, %v704_v49, 0.0  ;;  %v705_v29 = vmul.f32 %v2237_v47, %v2237_v47 }
 0x28e   :  { %737 = vadd.xlane.f32.xlu0 %v736_v19  ;;  %v653_v43 = vpop.xlane.xlu0 %652 }
 0x28f   :  { %v2249_v34 = vsub.f32 %v2162_v45, %v675_v56  ;;  %v676_v37 = vmul.f32 0.0625, %v653_v43  ;;  %v706_v60 = vmul.f32 %v2243_v55, %v2243_v55  ;;  %v739_v42 = vsel %vm128_vm0, %v705_v29, 0.0 }
 0x290   :  { %v656_v61 = vpop.xlane.xlu1 %655 }
 0x291   :  { %v2255_v62 = vsub.f32 %v2168_v52, %v676_v37  ;;  %v677_v63 = vmul.f32 0.0625, %v656_v61  ;;  %740 = vadd.xlane.f32.xlu1 %v739_v42  ;;  %v742_v0 = vsel %vm128_vm0, %v706_v60, 0.0  ;;  %v707_v4 = vmul.f32 %v2249_v34, %v2249_v34  ;;  %v2306_v61 = vld [vmem:[%s2480_s9] ss:$0 sm:$0xff] }
 0x292   :  { %743 = vadd.xlane.f32.xlu0 %v742_v0  ;;  %v659_v45 = vpop.xlane.xlu0 %658 }
 0x293   :  { %v2261_v5 = vsub.f32 %v2174_v59, %v677_v63  ;;  %v678_v7 = vmul.f32 0.0625, %v659_v45  ;;  %v708_v8 = vmul.f32 %v2255_v62, %v2255_v62  ;;  %v745_v52 = vsel %vm128_vm0, %v707_v4, 0.0 }
 0x294   :  { %v662_v46 = vpop.xlane.xlu1 %661 }
 0x295   :  { %v2267_v9 = vsub.f32 %v2172_v58, %v678_v7  ;;  %v679_v57 = vmul.f32 0.0625, %v662_v46  ;;  %746 = vadd.xlane.f32.xlu1 %v745_v52  ;;  %v748_v11 = vsel %vm128_vm0, %v708_v8, 0.0  ;;  %v709_v12 = vmul.f32 %v2261_v5, %v2261_v5 }
 0x296   :  { %749 = vadd.xlane.f32.xlu0 %v748_v11  ;;  %v2313_v11 = vld [vmem:[%s2481_s10] ss:$0 sm:$0xff] }
 0x297   :  { %v2273_v59 = vsub.f32 %v2178_v31, %v679_v57  ;;  %v710_v13 = vmul.f32 %v2267_v9, %v2267_v9  ;;  %v751_v2 = vsel %vm128_vm0, %v709_v12, 0.0  ;;  %v2287_v31 = vld [vmem:[%s104_s22] ss:$0 sm:$0xff] }
 0x298   :  { %vm881_vm4 = vcmp.eq.s32.totalorder %v873_v18, %v2287_v31  ;;  %vm882_vm5 = vcmp.eq.s32.totalorder %v2290_v20, %v2287_v31  ;;  %vm883_vm6 = vcmp.eq.s32.totalorder %v2295_v24, %v2287_v31  ;;  %vm884_vm7 = vcmp.eq.s32.totalorder %v2297_v26, %v2287_v31  ;;  %v891_v20 = vld [vmem:[#allocation2 + $0x10] sm:$0xff] }
 0x299   :  { %752 = vadd.xlane.f32.xlu1 %v751_v2  ;;  %v754_v58 = vsel %vm128_vm0, %v710_v13, 0.0  ;;  %v711_v16 = vmul.f32 %v2273_v59, %v2273_v59  ;;  %1656 = vmatprep.mubr.msk.f32.mxu1 %vm881_vm4, %v1885_v23 }
 0x29a   :  { %755 = vadd.xlane.f32.xlu0 %v754_v58 }
 0x29b   :  { %v757_v6 = vsel %vm128_vm0, %v711_v16, 0.0 }
 0x29d   :  { %758 = vadd.xlane.f32.xlu1 %v757_v6 }
 0x30a   :  { %v714_v27 = vpop.xlane.xlu0 %713 }
 0x30b   :  { %v760_v15 = vmul.f32 0.0625, %v714_v27 }
 0x30d   :  { %v776_v30 = vadd.f32 1e-05, %v760_v15 }
 0x30e   :  { %v717_v35 = vpop.xlane.xlu1 %716  ;;  %v720_v38 = vpop.xlane.xlu0 %719 }
 0x30f   :  { %1828 = vrsqrt.f32 %v776_v30  ;;  %v761_v39 = vmul.f32 0.0625, %v717_v35  ;;  %v762_v17 = vmul.f32 0.0625, %v720_v38 }
 0x311   :  { %v777_v40 = vadd.f32 1e-05, %v761_v39  ;;  %v778_v32 = vadd.f32 1e-05, %v762_v17 }
 0x312   :  { %v723_v22 = vpop.xlane.xlu1 %722  ;;  %v726_v25 = vpop.xlane.xlu0 %725 }
 0x313   :  { %1830 = vrsqrt.f32 %v777_v40  ;;  %v763_v44 = vmul.f32 0.0625, %v723_v22  ;;  %v764_v36 = vmul.f32 0.0625, %v726_v25 }
 0x314   :  { %1832 = vrsqrt.f32 %v778_v32 }
 0x315   :  { %v779_v48 = vadd.f32 1e-05, %v763_v44  ;;  %v780_v49 = vadd.f32 1e-05, %v764_v36 }
 0x316   :  { %v729_v51 = vpop.xlane.xlu1 %728  ;;  %v732_v53 = vpop.xlane.xlu0 %731 }
 0x317   :  { %1834 = vrsqrt.f32 %v779_v48  ;;  %v765_v56 = vmul.f32 0.0625, %v729_v51  ;;  %v766_v19 = vmul.f32 0.0625, %v732_v53 }
 0x318   :  { %1836 = vrsqrt.f32 %v780_v49 }
 0x319   :  { %v1829_v29 = vpop.eup %1828  ;;  %v781_v43 = vadd.f32 1e-05, %v765_v56  ;;  %v782_v37 = vadd.f32 1e-05, %v766_v19 }
 0x31a   :  { %v735_v60 = vpop.xlane.xlu1 %734  ;;  %v808_v42 = vmul.f32 %v1829_v29, %v2190_v3 }
 0x31b   :  { %1838 = vrsqrt.f32 %v781_v43  ;;  %v767_v63 = vmul.f32 0.0625, %v735_v60  ;;  %v738_v0 = vpop.xlane.xlu0 %737 }
 0x31c   :  { %1840 = vrsqrt.f32 %v782_v37  ;;  %v768_v4 = vmul.f32 0.0625, %v738_v0  ;;  %v830_v8 = vmul.f32 %v2306_v61, %v808_v42 }
 0x31d   :  { %v1831_v45 = vpop.eup %1830  ;;  %v783_v7 = vadd.f32 1e-05, %v767_v63 }
 0x31e   :  { %v1833_v46 = vpop.eup %1832  ;;  %v784_v52 = vadd.f32 1e-05, %v768_v4  ;;  %v741_v57 = vpop.xlane.xlu1 %740  ;;  %v809_v12 = vmul.f32 %v1831_v45, %v2198_v50  ;;  %v852_v18 = vadd.f32 %v2313_v11, %v830_v8 }
 0x31f   :  { %1842 = vrsqrt.f32 %v783_v7  ;;  %v769_v3 = vmul.f32 0.0625, %v741_v57  ;;  %v744_v13 = vpop.xlane.xlu0 %743  ;;  %v810_v2 = vmul.f32 %v1833_v46, %v2187_v1 }
 0x320   :  { %1844 = vrsqrt.f32 %v784_v52  ;;  %v770_v58 = vmul.f32 0.0625, %v744_v13  ;;  %v831_v16 = vmul.f32 %v2306_v61, %v809_v12 }
 0x321   :  { %v1835_v6 = vpop.eup %1834  ;;  %v785_v14 = vadd.f32 1e-05, %v769_v3  ;;  %v832_v38 = vmul.f32 %v2306_v61, %v810_v2 }
 0x322   :  { %v1837_v27 = vpop.eup %1836  ;;  %v786_v15 = vadd.f32 1e-05, %v770_v58  ;;  %v747_v30 = vpop.xlane.xlu1 %746  ;;  %v853_v35 = vadd.f32 %v2313_v11, %v831_v16  ;;  %v811_v50 = vmul.f32 %v1835_v6, %v2195_v54 }
 0x323   :  { %1846 = vrsqrt.f32 %v785_v14  ;;  %v771_v39 = vmul.f32 0.0625, %v747_v30  ;;  %v750_v1 = vpop.xlane.xlu0 %749  ;;  %v812_v17 = vmul.f32 %v1837_v27, %v2208_v10  ;;  %v854_v54 = vadd.f32 %v2313_v11, %v832_v38 }
 0x324   :  { %1848 = vrsqrt.f32 %v786_v15  ;;  %v772_v40 = vmul.f32 0.0625, %v750_v1  ;;  %v1696_v32 = vpack.c.bf16 %v853_v35, %v852_v18  ;;  %v833_v22 = vmul.f32 %v2306_v61, %v811_v50 }
 0x325   :  { %v1839_v25 = vpop.eup %1838  ;;  %v787_v44 = vadd.f32 1e-05, %v771_v39  ;;  %v834_v36 = vmul.f32 %v2306_v61, %v812_v17 }
 0x326   :  { %v1841_v48 = vpop.eup %1840  ;;  %v788_v49 = vadd.f32 1e-05, %v772_v40  ;;  %v753_v51 = vpop.xlane.xlu1 %752  ;;  %1697 = vmatprep.subr.bf16.mxu1 %v1696_v32  ;;  %v855_v53 = vadd.f32 %v2313_v11, %v833_v22  ;;  %v813_v56 = vmul.f32 %v1839_v25, %v2213_v21 }
 0x327   :  { %1850 = vrsqrt.f32 %v787_v44  ;;  %v773_v10 = vmul.f32 0.0625, %v753_v51  ;;  %v756_v19 = vpop.xlane.xlu0 %755  ;;  %1699 = vmatpush3.bf16.msra.mxu1 %v1696_v32  ;;  %v814_v29 = vmul.f32 %v1841_v48, %v2219_v28  ;;  %v856_v0 = vadd.f32 %v2313_v11, %v834_v36 }
 0x328   :  { %1852 = vrsqrt.f32 %v788_v49  ;;  %v774_v43 = vmul.f32 0.0625, %v756_v19  ;;  %v1700_v37 = vpack.c.bf16 %v855_v53, %v854_v54  ;;  %v835_v60 = vmul.f32 %v2306_v61, %v813_v56 }
 0x329   :  { %v1843_v42 = vpop.eup %1842  ;;  %v789_v63 = vadd.f32 1e-05, %v773_v10  ;;  %v836_v46 = vmul.f32 %v2306_v61, %v814_v29 }
 0x32a   :  { %v1845_v4 = vpop.eup %1844  ;;  %v790_v45 = vadd.f32 1e-05, %v774_v43  ;;  %v759_v7 = vpop.xlane.xlu1 %758  ;;  %1701 = vmatprep.subr.bf16.mxu1 %v1700_v37  ;;  %v857_v21 = vadd.f32 %v2313_v11, %v835_v60  ;;  %v815_v8 = vmul.f32 %v1843_v42, %v2225_v33 }
 0x32b   :  { %1854 = vrsqrt.f32 %v789_v63  ;;  %v775_v28 = vmul.f32 0.0625, %v759_v7  ;;  %1703 = vmatpush3.bf16.msra.mxu1 %v1700_v37  ;;  %v816_v52 = vmul.f32 %v1845_v4, %v2234_v41  ;;  %v858_v58 = vadd.f32 %v2313_v11, %v836_v46  ;;  %v892_v37 = vld [vmem:[#allocation2 + $0x18] sm:$0xff] }
 0x32c   :  { %1856 = vrsqrt.f32 %v790_v45  ;;  %v1704_v57 = vpack.c.bf16 %v857_v21, %v856_v0  ;;  %v837_v12 = vmul.f32 %v2306_v61, %v815_v8 }
 0x32d   :  { %v1847_v3 = vpop.eup %1846  ;;  %v791_v13 = vadd.f32 1e-05, %v775_v28  ;;  %v838_v6 = vmul.f32 %v2306_v61, %v816_v52 }
 0x32e   :  { %v1849_v2 = vpop.eup %1848  ;;  %1705 = vmatprep.subr.bf16.mxu1 %v1704_v57  ;;  %v859_v16 = vadd.f32 %v2313_v11, %v837_v12  ;;  %v817_v33 = vmul.f32 %v1847_v3, %v2237_v47 }
 0x32f   :  { %1858 = vrsqrt.f32 %v791_v13  ;;  %1707 = vmatpush3.bf16.msra.mxu1 %v1704_v57  ;;  %v818_v41 = vmul.f32 %v1849_v2, %v2243_v55  ;;  %v860_v30 = vadd.f32 %v2313_v11, %v838_v6 }
 0x330   :  { %v1708_v14 = vpack.c.bf16 %v859_v16, %v858_v58  ;;  %v839_v18 = vmul.f32 %v2306_v61, %v817_v33 }
 0x331   :  { %v1851_v27 = vpop.eup %1850  ;;  %v840_v47 = vmul.f32 %v2306_v61, %v818_v41 }
 0x332   :  { %v1853_v15 = vpop.eup %1852  ;;  %1709 = vmatprep.subr.bf16.mxu1 %v1708_v14  ;;  %v861_v35 = vadd.f32 %v2313_v11, %v839_v18  ;;  %v819_v50 = vmul.f32 %v1851_v27, %v2249_v34 }
 0x333   :  { %1711 = vmatpush3.bf16.msra.mxu1 %v1708_v14  ;;  %v820_v38 = vmul.f32 %v1853_v15, %v2255_v62  ;;  %v862_v40 = vadd.f32 %v2313_v11, %v840_v47 }
 0x334   :  { %v1712_v39 = vpack.c.bf16 %v861_v35, %v860_v30  ;;  %v841_v55 = vmul.f32 %v2306_v61, %v819_v50 }
 0x335   :  { %v1855_v1 = vpop.eup %1854  ;;  %v842_v25 = vmul.f32 %v2306_v61, %v820_v38 }
 0x336   :  { %v1857_v17 = vpop.eup %1856  ;;  %1713 = vmatprep.subr.bf16.mxu1 %v1712_v39  ;;  %v863_v32 = vadd.f32 %v2313_v11, %v841_v55  ;;  %v821_v22 = vmul.f32 %v1855_v1, %v2261_v5 }
 0x337   :  { %1715 = vmatpush3.bf16.msra.mxu1 %v1712_v39  ;;  %v822_v34 = vmul.f32 %v1857_v17, %v2267_v9  ;;  %v864_v48 = vadd.f32 %v2313_v11, %v842_v25 }
 0x338   :  { %v1716_v44 = vpack.c.bf16 %v863_v32, %v862_v40  ;;  %v843_v62 = vmul.f32 %v2306_v61, %v821_v22 }
 0x339   :  { %v1859_v36 = vpop.eup %1858  ;;  %v844_v54 = vmul.f32 %v2306_v61, %v822_v34 }
 0x33a   :  { %1717 = vmatprep.subr.bf16.mxu1 %v1716_v44  ;;  %v865_v49 = vadd.f32 %v2313_v11, %v843_v62  ;;  %v823_v51 = vmul.f32 %v1859_v36, %v2273_v59  ;;  %v890_v59 = vld [vmem:[#allocation2 + $0x8] sm:$0xff] }
 0x33b   :  { %1719 = vmatpush3.bf16.msra.mxu1 %v1716_v44  ;;  %v866_v9 = vadd.f32 %v2313_v11, %v844_v54 }
 0x33c   :  { %v1720_v5 = vpack.c.bf16 %v865_v49, %v864_v48  ;;  %v845_v53 = vmul.f32 %v2306_v61, %v823_v51  ;;  %v889_v61 = vld [vmem:[#allocation2] sm:$0xff] }
 0x33e   :  { %1721 = vmatprep.subr.bf16.mxu1 %v1720_v5  ;;  %v867_v56 = vadd.f32 %v2313_v11, %v845_v53 }
 0x33f   :  { %1723 = vmatpush3.bf16.msra.mxu1 %v1720_v5 }
 0x340   :  { %v1724_v10 = vpack.c.bf16 %v867_v56, %v866_v9 }
 0x342   :  { %1725 = vmatprep.subr.bf16.mxu1 %v1724_v10 }
 0x343   :  { %1727 = vmatpush3.bf16.msra.mxu1 %v1724_v10 }
 0x346   :  { %1657 = vmatmul.mubr.msk.f32.vlgmr.msra.gmra.mrb[16].mxu1 %vm882_vm5, %v1885_v23 }
 0x347   :  { %1659 = vmatprep.mubr.msk.f32.mxu1 %vm883_vm6, %v1885_v23 }
 0x34a   :  { %1660 = vmatmul.mubr.msk.f32.gmra.mrb[18].mxu1 %vm884_vm7, %v1885_v23 }
 0x419   :  { %v1658_v11 = vpop.f32.mrb[16].mxu1 }
 0x41a   :  { %v979_v19 = vadd.f32 %v1658_v11, %v890_v59  ;;  %v959_v29 = vpop.f32.mrb[17].mxu1 }
 0x41b   :  { %v978_v43 = vadd.f32 %v959_v29, %v889_v61 }
 0x41c   :  { %983 = vst.msk [vmem:[#allocation2 + $0x8] sm:$0xff] %vm128_vm0, %v979_v19 }
 0x41d   :  { %982 = vst.msk [vmem:[#allocation2] sm:$0xff] %vm128_vm0, %v978_v43  ;;  %v1661_v60 = vpop.f32.mrb[18].mxu1 }
 0x41e   :  { %v981_v24 = vadd.f32 %v1661_v60, %v892_v37  ;;  %v969_v42 = vpop.f32.mrb[19].mxu1 }
 0x41f   :  { %v980_v63 = vadd.f32 %v969_v42, %v891_v20 }
 0x420   :  { %985 = vst.msk [vmem:[#allocation2 + $0x18] sm:$0xff] %vm128_vm0, %v981_v24 }
 0x421   :  { %984 = vst.msk [vmem:[#allocation2 + $0x10] sm:$0xff] %vm128_vm0, %v980_v63 }
 0x422 PF:  { %v999_v31 = vld [vmem:[%s2483_s12] sm:$0xff]  ;;  %v1000_v23 = vld [vmem:[%s2483_s12 + $0x8] sm:$0xff]  ;;  %s2501_s0 = sld [smem:[#allocation8_spill]]  ;;  %v1237_v58 = vld [vmem:[%s2485_s14 + $0x10] sm:$0xff]  ;;  %vm1246_vm8 = vcmask 261120  }
 0x423   :  { %v1728_v0 = vpack.c.bf16 %v1000_v23, %v999_v31  ;;  %v997_v4 = vld [vmem:[%s2482_s11] sm:$0xff]  ;;  %v998_v45 = vld [vmem:[%s2482_s11 + $0x8] sm:$0xff]  ;;  %v1238_v16 = vld [vmem:[%s2485_s14 + $0x18] sm:$0xff] }
 0x424   :  { %v1732_v7 = vpack.c.bf16 %v998_v45, %v997_v4  ;;  %v993_v28 = vld [vmem:[#allocation2] sm:$0xff]  ;;  %v994_v52 = vld [vmem:[#allocation2 + $0x8] sm:$0xff]  ;;  %v1740_v33 = vpack.c.bf16 %v1238_v16, %v1237_v58 }
 0x425   :  { %1729 = vmatprep.subr.bf16.mxu0 %v1728_v0  ;;  %v1235_v3 = vld [vmem:[%s2485_s14] sm:$0xff]  ;;  %v1236_v13 = vld [vmem:[%s2485_s14 + $0x8] sm:$0xff] }
 0x426   :  { %1731 = vmatpush3.bf16.msra.mxu0 %v1728_v0  ;;  %v1736_v2 = vpack.c.bf16 %v1236_v13, %v1235_v3  ;;  %v1509_v6 = vld [vmem:[%s2484_s13] ss:$0 sm:$0xff] }
 0x427   :  { %1733 = vmatprep.subr.bf16.mxu0 %v1732_v7  ;;  %v996_v12 = vld [vmem:[#allocation2 + $0x18] sm:$0xff]  ;;  %v1514_v9 = vld [vmem:[%s2486_s15] ss:$0 sm:$0xff] }
 0x428   :  { %v2386_v26 = vld [vmem:[%s2501_s0] sm:$0xff]  ;;  %v2399_v21 = vld [vmem:[%s2501_s0 + $0x8] sm:$0xff]  ;;  %v2404_v8 = vld [vmem:[%s2501_s0 + $0x10] sm:$0xff]  ;;  %1737 = vmatprep.subr.bf16.mxu1 %v1736_v2 }
 0x429   :  { %1666 = vmatprep.mubr.msk.f32.mxu0 %vm128_vm0, %v2386_v26  ;;  %v2413_v46 = vld [vmem:[%s2501_s0 + $0x18] sm:$0xff]  ;;  %v995_v57 = vld [vmem:[#allocation2 + $0x10] sm:$0xff]  ;;  %1739 = vmatpush3.bf16.msra.mxu1 %v1736_v2 }
 0x42a   :  { %1667 = vmatmul.mubr.msk.f32.vlgmr.msra.gmra.mrb[0].mxu0 %vm128_vm0, %v2399_v21  ;;  %1741 = vmatprep.subr.bf16.mxu1 %v1740_v33 }
 0x42b   :  { %1735 = vmatpush3.bf16.msra.mxu0 %v1732_v7  ;;  %1669 = vmatprep.mubr.msk.f32.mxu0 %vm128_vm0, %v2404_v8 }
 0x42d   :  { %1743 = vmatpush3.bf16.msra.mxu1 %v1740_v33 }
 0x42e   :  { %1670 = vmatmul.mubr.msk.f32.gmra.mrb[2].mxu0 %vm128_vm0, %v2413_v46 }
 0x42f   :  { %1676 = vmatprep.mubr.msk.f32.mxu0 %vm128_vm0, %v993_v28 }
 0x432   :  { %1677 = vmatmul.mubr.msk.f32.vlgmr.msra.gmra.mrb[0].mxu0 %vm128_vm0, %v994_v52 }
 0x433   :  { %1679 = vmatprep.mubr.msk.f32.mxu0 %vm128_vm0, %v995_v57 }
 0x436   :  { %1680 = vmatmul.mubr.msk.f32.gmra.mrb[2].mxu0 %vm128_vm0, %v996_v12 }
 0x505   :  { %v1678_v41 = vpop.f32.mrb[0].mxu0 }
 0x506   :  { %v1204_v14 = vadd.f32 %v1678_v41, %v1509_v6  ;;  %v1177_v18 = vpop.f32.mrb[1].mxu0 }
 0x507   :  { %v1203_v27 = vadd.f32 %v1509_v6, %v1177_v18 }
 0x508   :  { %v1511_v15 = vmul.f32 -1.442695, %v1204_v14 }
 0x509   :  { %v1510_v30 = vmul.f32 -1.442695, %v1203_v27  ;;  %v1681_v35 = vpop.f32.mrb[2].mxu0 }
 0x50a   :  { %1860 = vpow2.f32 %v1511_v15  ;;  %v1206_v50 = vadd.f32 %v1681_v35, %v1509_v6  ;;  %v1187_v47 = vpop.f32.mrb[3].mxu0 }
 0x50b   :  { %1862 = vpow2.f32 %v1510_v30  ;;  %v1205_v38 = vadd.f32 %v1509_v6, %v1187_v47 }
 0x50c   :  { %v1513_v39 = vmul.f32 -1.442695, %v1206_v50 }
 0x50d   :  { %v1512_v55 = vmul.f32 -1.442695, %v1205_v38 }
 0x50e   :  { %1864 = vpow2.f32 %v1513_v39 }
 0x50f   :  { %1866 = vpow2.f32 %v1512_v55 }
 0x514   :  { %v1861_v1 = vpop.eup %1860 }
 0x515   :  { %v1863_v17 = vpop.eup %1862  ;;  %v1220_v40 = vadd.f32 1.0, %v1861_v1 }
 0x516   :  { %v1219_v32 = vadd.f32 1.0, %v1863_v17 }
 0x517   :  { %1868 = vrcp.f32 %v1220_v40  ;;  %v1519_v40 = vld [vmem:[%s2487_s16] ss:$0 sm:$0xff]  ;;  %s2502_s16 = sld [smem:[#allocation9_spill]] }
 0x518   :  { %v1865_v22 = vpop.eup %1864  ;;  %1870 = vrcp.f32 %v1219_v32 }
 0x519   :  { %v1867_v25 = vpop.eup %1866  ;;  %v1222_v34 = vadd.f32 1.0, %v1865_v22  ;;  %v1520_v22 = vld [vmem:[%s2488_s17] ss:$0 sm:$0xff] }
 0x51a   :  { %v1221_v44 = vadd.f32 1.0, %v1867_v25 }
 0x51b   :  { %1872 = vrcp.f32 %v1222_v34 }
 0x51c   :  { %1874 = vrcp.f32 %v1221_v44 }
 0x521   :  { %v1869_v62 = vpop.eup %1868 }
 0x522   :  { %v1871_v36 = vpop.eup %1870  ;;  %v1232_v49 = vmul.f32 %v1869_v62, %v1204_v14 }
 0x523   :  { %v1231_v48 = vmul.f32 %v1871_v36, %v1203_v27 }
 0x525   :  { %v1873_v51 = vpop.eup %1872  ;;  %1690 = vmatprep.mubr.msk.f32.mxu1 %vm1246_vm8, %v1231_v48 }
 0x526   :  { %v1875_v54 = vpop.eup %1874  ;;  %1691 = vmatmul.mubr.msk.f32.vlgmr.msra.gmra.mrb[0].mxu1 %vm1246_vm8, %v1232_v49  ;;  %v1234_v53 = vmul.f32 %v1873_v51, %v1206_v50 }
 0x527   :  { %v1233_v5 = vmul.f32 %v1875_v54, %v1205_v38 }
 0x529   :  { %1693 = vmatprep.mubr.msk.f32.mxu1 %vm1246_vm8, %v1233_v5 }
 0x52a   :  { %1694 = vmatmul.mubr.msk.f32.gmra.mrb[2].mxu1 %vm1246_vm8, %v1234_v53 }
 0x5f9   :  { %v1692_v56 = vpop.f32.mrb[0].mxu1 }
 0x5fa   :  { %v1325_v10 = vpop.f32.mrb[1].mxu1  ;;  %v1331_v61 = vadd.f32 %v1692_v56, %v1514_v9 }
 0x5fb   :  { %v1326_v59 = vadd.f32 %v1514_v9, %v1325_v10 }
 0x5fc   :  { %v1349_v20 = vsel %vm128_vm0, %v1331_v61, 0.0 }
 0x5fd   :  { %v1695_v11 = vpop.f32.mrb[2].mxu1  ;;  %v1346_v19 = vsel %vm128_vm0, %v1326_v59, 0.0 }
 0x5fe   :  { %1347 = vadd.xlane.f32.xlu0 %v1346_v19  ;;  %v1335_v29 = vpop.f32.mrb[3].mxu1  ;;  %v1341_v37 = vadd.f32 %v1695_v11, %v1514_v9 }
 0x5ff   :  { %v1336_v43 = vadd.f32 %v1514_v9, %v1335_v29 }
 0x600   :  { %v1355_v24 = vsel %vm128_vm0, %v1341_v37, 0.0 }
 0x601   :  { %v1352_v60 = vsel %vm128_vm0, %v1336_v43, 0.0 }
 0x602   :  { %1350 = vadd.xlane.f32.xlu0 %v1349_v20  ;;  %1353 = vadd.xlane.f32.xlu1 %v1352_v60 }
 0x606   :  { %1356 = vadd.xlane.f32.xlu1 %v1355_v24 }
 0x68b   :  { %v1348_v42 = vpop.xlane.xlu0 %1347 }
 0x68c   :  { %v1359_v63 = vmul.f32 0.0625, %v1348_v42 }
 0x68e   :  { %v1363_v31 = vsub.f32 %v1326_v59, %v1359_v63 }
 0x68f   :  { %v1351_v23 = vpop.xlane.xlu0 %1350  ;;  %v1354_v0 = vpop.xlane.xlu1 %1353 }
 0x690   :  { %v1360_v4 = vmul.f32 0.0625, %v1351_v23  ;;  %v1361_v45 = vmul.f32 0.0625, %v1354_v0  ;;  %v1367_v7 = vmul.f32 %v1363_v31, %v1363_v31 }
 0x692   :  { %v1364_v28 = vsub.f32 %v1331_v61, %v1360_v4  ;;  %v1365_v52 = vsub.f32 %v1336_v43, %v1361_v45  ;;  %v1371_v57 = vsel %vm128_vm0, %v1367_v7, 0.0 }
 0x693   :  { %1372 = vadd.xlane.f32.xlu0 %v1371_v57  ;;  %v1357_v12 = vpop.xlane.xlu1 %1356 }
 0x694   :  { %v1362_v3 = vmul.f32 0.0625, %v1357_v12  ;;  %v1368_v13 = vmul.f32 %v1364_v28, %v1364_v28  ;;  %v1369_v2 = vmul.f32 %v1365_v52, %v1365_v52 }
 0x696   :  { %v1366_v58 = vsub.f32 %v1341_v37, %v1362_v3  ;;  %v1374_v16 = vsel %vm128_vm0, %v1368_v13, 0.0  ;;  %v1377_v33 = vsel %vm128_vm0, %v1369_v2, 0.0 }
 0x697   :  { %1375 = vadd.xlane.f32.xlu1 %v1374_v16  ;;  %1378 = vadd.xlane.f32.xlu0 %v1377_v33 }
 0x698   :  { %v1370_v6 = vmul.f32 %v1366_v58, %v1366_v58 }
 0x69a   :  { %v1380_v41 = vsel %vm128_vm0, %v1370_v6, 0.0 }
 0x69b   :  { %1381 = vadd.xlane.f32.xlu1 %v1380_v41 }
 0x720   :  { %v1373_v14 = vpop.xlane.xlu0 %1372 }
 0x721   :  { %v1383_v18 = vmul.f32 0.0625, %v1373_v14 }
 0x723   :  { %v1387_v27 = vadd.f32 1e-05, %v1383_v18 }
 0x724   :  { %v1379_v15 = vpop.xlane.xlu0 %1378  ;;  %v1376_v30 = vpop.xlane.xlu1 %1375 }
 0x725   :  { %1876 = vrsqrt.f32 %v1387_v27  ;;  %v1385_v35 = vmul.f32 0.0625, %v1379_v15  ;;  %v1384_v50 = vmul.f32 0.0625, %v1376_v30 }
 0x727   :  { %v1389_v47 = vadd.f32 1e-05, %v1385_v35  ;;  %v1388_v38 = vadd.f32 1e-05, %v1384_v50 }
 0x728   :  { %v1382_v39 = vpop.xlane.xlu1 %1381 }
 0x729   :  { %1878 = vrsqrt.f32 %v1389_v47  ;;  %v1386_v55 = vmul.f32 0.0625, %v1382_v39 }
 0x72a   :  { %1880 = vrsqrt.f32 %v1388_v38 }
 0x72b   :  { %v1390_v1 = vadd.f32 1e-05, %v1386_v55 }
 0x72d   :  { %1882 = vrsqrt.f32 %v1390_v1 }
 0x72f   :  { %v1877_v17 = vpop.eup %1876 }
 0x730   :  { %v1395_v32 = vmul.f32 %v1877_v17, %v1363_v31 }
 0x732   :  { %v1405_v25 = vmul.f32 %v1519_v40, %v1395_v32 }
 0x733   :  { %v1879_v34 = vpop.eup %1878 }
 0x734   :  { %v1881_v44 = vpop.eup %1880  ;;  %v1415_v62 = vadd.f32 %v1520_v22, %v1405_v25  ;;  %v1397_v36 = vmul.f32 %v1879_v34, %v1365_v52 }
 0x735   :  { %v1396_v48 = vmul.f32 %v1881_v44, %v1364_v28 }
 0x736   :  { %v1419_v49 = vadd.f32 %v1415_v62, %v2386_v26  ;;  %v1407_v51 = vmul.f32 %v1519_v40, %v1397_v36 }
 0x737   :  { %v1883_v54 = vpop.eup %1882  ;;  %v1406_v5 = vmul.f32 %v1519_v40, %v1396_v48 }
 0x738   :  { %1423 = vst.msk [vmem:[%s2502_s16] sm:$0xff] %vm128_vm0, %v1419_v49  ;;  %v1417_v53 = vadd.f32 %v1520_v22, %v1407_v51  ;;  %v1398_v9 = vmul.f32 %v1883_v54, %v1366_v58 }
 0x739   :  { %v1416_v56 = vadd.f32 %v1520_v22, %v1406_v5 }
 0x73a   :  { %v1421_v10 = vadd.f32 %v1417_v53, %v2404_v8  ;;  %v1408_v59 = vmul.f32 %v1519_v40, %v1398_v9 }
 0x73b   :  { %v1420_v61 = vadd.f32 %v1416_v56, %v2399_v21 }
 0x73c   :  { %1425 = vst.msk [vmem:[%s2502_s16 + $0x10] sm:$0xff] %vm128_vm0, %v1421_v10  ;;  %v1418_v26 = vadd.f32 %v1520_v22, %v1408_v59 }
 0x73d   :  { %1424 = vst.msk [vmem:[%s2502_s16 + $0x8] sm:$0xff] %vm128_vm0, %v1420_v61 }
 0x73e   :  { %v1422_v11 = vadd.f32 %v1418_v26, %v2413_v46 }
 0x740   :  { %1426 = vst.msk [vmem:[%s2502_s16 + $0x18] sm:$0xff] %vm128_vm0, %v1422_v11 }

</bundles_post_ra>
